<compile_context>
chip_gen: v5e
topology: v5e:2x2
jax: 0.10.0
libtpu: 0.0.40
codegen_flags: <defaults>
</compile_context>

<pallas_src>
import math

import jax
import jax.numpy as jnp
from jax.experimental import pallas as pl
from jax.experimental.pallas import tpu as pltpu

HIDDEN_DIM = 128                 # hidden_dim
TIME_DIM = 128                   # time_dim (condition_time == 'embed')
LATENT_DIM = 256                 # latent_dim
FEAT_DIM = LATENT_DIM + TIME_DIM + HIDDEN_DIM   # 512: [z | time | lattice]
MAX_POSITIONS = 10000.0


def _round_up(x, m):
    return (x + m - 1) // m * m


# --------------------------------------------------------------------------
# Fused Pallas kernel:
#   sinusoidal time embedding -> fc_time MLP
#   lattice_emb MLP (K=9 layer on the VPU)
#   repeat_interleave scatter to a lane-dense (TN, 512) per-atom output tile
# --------------------------------------------------------------------------
def decoder_kernel(batch_ref, crys_ref, z_ref,
                   wt1_ref, bt1_ref, wt2_ref, bt2_ref,
                   wl1_ref, bl1_ref, wl2_ref, bl2_ref,
                   out_ref):
    b_pad = crys_ref.shape[0]

    # ---- fused sinusoidal timestep embedding (exp/sin/cos -> EUP slot) -----
    lane = jax.lax.broadcasted_iota(jnp.int32, (b_pad, TIME_DIM), 1)
    half = TIME_DIM // 2
    k = jnp.where(lane < half, lane, lane - half).astype(jnp.float32)
    freq = jnp.exp(k * (-math.log(MAX_POSITIONS) / (half - 1)))
    t_col = crys_ref[:, 0:1]                      # raw timesteps, column 0
    arg = t_col * freq                            # (B_pad, 128)
    t_sin = jnp.where(lane < half, jnp.sin(arg), jnp.cos(arg))   # f32

    # ---- fc_time: Linear(128,512) -> ReLU -> Linear(512,128)  (MXU, bf16 in,
    #      f32 accumulation) ---------------------------------------------------
    h = jnp.dot(t_sin.astype(jnp.bfloat16), wt1_ref[...],
                preferred_element_type=jnp.float32) + bt1_ref[...]
    h = jnp.maximum(h, 0.0)
    time_feat = jnp.dot(h.astype(jnp.bfloat16), wt2_ref[...],
                        preferred_element_type=jnp.float32) + bt2_ref[...]

    # ---- lattice_emb layer 1: Linear(9,128) as 9 VPU multiply-adds ----------
    # (avoids a K=128 MXU matmul that would be 93% zero padding)
    g = bl1_ref[...]                              # (1, 128) bias
    for kk in range(9):
        g = g + crys_ref[:, 1 + kk:2 + kk] * wl1_ref[kk:kk + 1, :]
    g = jnp.maximum(g, 0.0)
    # ---- lattice_emb layer 2: Linear(128,128) on MXU ------------------------
    lat_feat = jnp.dot(g.astype(jnp.bfloat16), wl2_ref[...],
                       preferred_element_type=jnp.float32) + bl2_ref[...]

    # per-crystal feature slab [z | time_feat | lattice_feat]  : (B_pad, 512)
    crys_feats = jnp.concatenate([z_ref[...], time_feat, lat_feat], axis=1)

    # ---- repeat_interleave (per-crystal -> per-atom) as an exact VPU select
    # gather over the (small) crystal dimension, writing one lane-dense tile.
    # TODO(synk): for large B this O(N*B) select should become a scalar-prefetch
    # pl.Element row gather (two-call form) instead of an unrolled select.
    b_idx = batch_ref[...]                        # (TN, 1) int32 crystal index
    acc = jnp.zeros(out_ref.shape, jnp.float32)
    for b in range(b_pad):
        acc = jnp.where(b_idx == b, crys_feats[b:b + 1, :], acc)
    out_ref[...] = acc.astype(out_ref.dtype)


def run_decoder_kernel(params, t, lattices, z, batch, n_nodes):
    """One fused pallas_call: embed + both MLPs + scatter -> (N, 512) slab."""
    B = t.shape[0]
    b_pad = _round_up(B, 8)                                   # sublane multiple
    tn = 512 if n_nodes >= 512 else _round_up(max(n_nodes, 1), 8)
    n_pad = _round_up(n_nodes, tn)

    # Tiny lane-aligned per-crystal input: column 0 = t, columns 1..9 = lattice.
    crys_in = jnp.zeros((b_pad, 128), jnp.float32)
    crys_in = crys_in.at[:B, 0].set(t.astype(jnp.float32))
    crys_in = crys_in.at[:B, 1:10].set(lattices.reshape(B, 9).astype(jnp.float32))
    z_pad = jnp.zeros((b_pad, LATENT_DIM), jnp.float32).at[:B].set(
        z.astype(jnp.float32))
    batch_pad = jnp.zeros((n_pad, 1), jnp.int32).at[:n_nodes, 0].set(batch)

    args = (batch_pad, crys_in, z_pad,
            params["wt1"], params["bt1"], params["wt2"], params["bt2"],
            params["wl1"], params["bl1"], params["wl2"], params["bl2"])

    in_specs = [pl.BlockSpec((tn, 1), lambda i: (i, 0))]      # per-atom indices
    in_specs += [pl.BlockSpec(a.shape, lambda i: (0, 0))      # resident blocks
                 for a in args[1:]]

    out = pl.pallas_call(
        decoder_kernel,
        grid=(n_pad // tn,),
        in_specs=in_specs,
        out_specs=pl.BlockSpec((tn, FEAT_DIM), lambda i: (i, 0)),
        out_shape=jax.ShapeDtypeStruct((n_pad, FEAT_DIM), jnp.float32),
        compiler_params=pltpu.CompilerParams(
            dimension_semantics=("parallel",)),
    )(*args)
    return out[:n_nodes]


# --------------------------------------------------------------------------
# Plain-JAX glue (matches the PyTorch helpers used by the module).
# --------------------------------------------------------------------------
def get_timestep_embedding(timesteps, embedding_dim, max_positions=MAX_POSITIONS):
    half_dim = embedding_dim // 2
    emb = math.log(max_positions) / (half_dim - 1)
    emb = jnp.exp(jnp.arange(half_dim, dtype=jnp.float32) * -emb)
    emb = timesteps.astype(jnp.float32)[:, None] * emb[None, :]
    return jnp.concatenate([jnp.sin(emb), jnp.cos(emb)], axis=1)


def lattice_params_from_matrix(lattices):
    lengths = jnp.sqrt(jnp.sum(lattices ** 2, axis=-1))              # (B, 3)
    angs = []
    for i in range(3):
        j, k = (i + 1) % 3, (i + 2) % 3
        denom = jnp.maximum(lengths[..., j] * lengths[..., k], 1e-12)
        cos = jnp.sum(lattices[..., j, :] * lattices[..., k, :], axis=-1) / denom
        angs.append(jnp.arccos(jnp.clip(cos, -1.0, 1.0)))
    angles = jnp.stack(angs, axis=-1) * (180.0 / math.pi)            # degrees
    return lengths, angles


def init_params(key):
    """Deterministic synthetic weights (shapes match the nn.Linear layers,
    stored already transposed as (in, out); matmul weights in bf16)."""
    ks = jax.random.split(key, 6)

    def uniform_fan(k, shape):
        fan_in, fan_out = shape
        lim = math.sqrt(6.0 / (fan_in + fan_out))
        return jax.random.uniform(k, shape, jnp.float32, -lim, lim)

    # lattice_emb layer-1 weight keeps only its 9 real rows (padded to 16 for
    # sublane alignment) and stays f32 (it feeds the VPU path, not the MXU).
    wl1 = jnp.zeros((16, HIDDEN_DIM), jnp.float32).at[:9, :].set(
        jax.random.uniform(ks[2], (9, HIDDEN_DIM), jnp.float32,
                           -1.0 / 3.0, 1.0 / 3.0))
    lim2 = 1.0 / math.sqrt(HIDDEN_DIM)
    return {
        # fc_time = Linear(128,512) -> ReLU -> Linear(512,128), zero biases
        "wt1": uniform_fan(ks[0], (TIME_DIM, TIME_DIM * 4)).astype(jnp.bfloat16),
        "bt1": jnp.zeros((1, TIME_DIM * 4), jnp.float32),
        "wt2": uniform_fan(ks[1], (TIME_DIM * 4, TIME_DIM)).astype(jnp.bfloat16),
        "bt2": jnp.zeros((1, TIME_DIM), jnp.float32),
        # lattice_emb = Linear(9,128) -> ReLU -> Linear(128,128)
        "wl1": wl1,
        "bl1": jax.random.uniform(ks[4], (1, HIDDEN_DIM), jnp.float32,
                                  -1.0 / 3.0, 1.0 / 3.0),
        "wl2": jax.random.uniform(ks[3], (HIDDEN_DIM, HIDDEN_DIM), jnp.float32,
                                  -lim2, lim2).astype(jnp.bfloat16),
        "bl2": jax.random.uniform(ks[5], (1, HIDDEN_DIM), jnp.float32,
                                  -lim2, lim2),
    }


def base_decoder_forward(params, t, frac_coords, atom_types, natoms,
                         lattices, z):
    """Mirrors BaseDecoder.forward semantics (bundle_feats + graph metadata)."""
    B = natoms.shape[0]
    N = frac_coords.shape[0]

    # batch = arange(B).repeat_interleave(natoms)
    batch = jnp.repeat(jnp.arange(B, dtype=jnp.int32), natoms,
                       total_repeat_length=N)

    # bundle_feats: one fused kernel -> (N, 512) = [z | fc_time(emb(t)) | lattice_emb]
    node_slab = run_decoder_kernel(params, t, lattices, z, batch, N)
    node_feats = [node_slab[:, :LATENT_DIM],
                  node_slab[:, LATENT_DIM:LATENT_DIM + TIME_DIM],
                  node_slab[:, LATENT_DIM + TIME_DIM:]]

    # lattices -> lengths / angles (gnn inputs)
    lengths, angles = lattice_params_from_matrix(lattices)

    # TODO(synk): BaseDecoder.gnn is a stub (lambda returning None), so the
    # downstream softmax over outs['atoms'] and key_map cannot be reproduced;
    # we return the computed node features / graph metadata instead.
    return {
        "node_feat_slab": node_slab,
        "node_feats": node_feats,
        "pos": frac_coords,
        "atomic_numbers": atom_types - 1,
        "batch": batch,
        "lengths": lengths,
        "angles": angles,
    }


# --------------------------------------------------------------------------
# Pure-JAX f32 reference of the fused hot path (for a sanity check only).
# --------------------------------------------------------------------------
def ref_node_feats(params, t, lattices, z, batch):
    hp = jax.lax.Precision.HIGHEST
    t_sin = get_timestep_embedding(t, TIME_DIM)
    h = jnp.maximum(jnp.dot(t_sin, params["wt1"].astype(jnp.float32),
                            precision=hp) + params["bt1"], 0.0)
    time_feat = jnp.dot(h, params["wt2"].astype(jnp.float32),
                        precision=hp) + params["bt2"]
    lat9 = lattices.reshape(-1, 9).astype(jnp.float32)
    g = jnp.maximum(jnp.dot(lat9, params["wl1"][:9], precision=hp)
                    + params["bl1"], 0.0)
    lat_feat = jnp.dot(g, params["wl2"].astype(jnp.float32),
                       precision=hp) + params["bl2"]
    return jnp.concatenate([z, time_feat, lat_feat], axis=1)[batch]


if __name__ == "__main__":
    key = jax.random.PRNGKey(0)
    k_p, k_z, k_c, k_l, k_a, k_t = jax.random.split(key, 6)

    params = init_params(k_p)

    B = 2                                   # number of crystals
    natoms = jnp.array([3, 5], jnp.int32)
    N = 8                                   # total atoms

    t = jax.random.uniform(k_t, (B,), jnp.float32) * 999.0
    frac_coords = jax.random.uniform(k_c, (N, 3), jnp.float32)
    atom_types = jax.random.randint(k_a, (N,), 1, 20).astype(jnp.int32)
    lattices = (jnp.eye(3)[None] * 5.0
                + 0.1 * jax.random.normal(k_l, (B, 3, 3), jnp.float32))
    z = jax.random.normal(k_z, (B, LATENT_DIM), jnp.float32)

    outs = base_decoder_forward(params, t, frac_coords, atom_types, natoms,
                                lattices, z)
    jax.block_until_ready(outs)

    # shape sanity
    slab = outs["node_feat_slab"]
    assert slab.shape == (N, FEAT_DIM)
    assert outs["node_feats"][0].shape == (N, LATENT_DIM)
    assert outs["node_feats"][1].shape == (N, TIME_DIM)
    assert outs["node_feats"][2].shape == (N, HIDDEN_DIM)
    assert outs["lengths"].shape == (B, 3) and outs["angles"].shape == (B, 3)
    assert outs["batch"].shape == (N,)

    # correctness sanity: the z-segment scatter is an exact copy; the MLP
    # segments match a pure-f32 reference up to bf16 activation rounding.
    batch = outs["batch"]
    assert bool(jnp.array_equal(slab[:, :LATENT_DIM], z[batch]))
    ref = ref_node_feats(params, t, lattices, z, batch)
    err = float(jnp.max(jnp.abs(slab[:, LATENT_DIM:] - ref[:, LATENT_DIM:])))
    assert err < 0.3, f"max abs err vs f32 reference: {err}"

    print("KERNEL_OK")
</pallas_src>

<mosaic_0001>
module attributes {stable_mosaic.version = 11 : i64} {
  func.func @decoder_kernel(%arg0: i32, %arg1: memref<8x1xi32, #tpu.memory_space<vmem>>, %arg2: memref<8x128xf32, #tpu.memory_space<vmem>>, %arg3: memref<8x256xf32, #tpu.memory_space<vmem>>, %arg4: memref<128x512xbf16, #tpu.memory_space<vmem>>, %arg5: memref<1x512xf32, #tpu.memory_space<vmem>>, %arg6: memref<512x128xbf16, #tpu.memory_space<vmem>>, %arg7: memref<1x128xf32, #tpu.memory_space<vmem>>, %arg8: memref<16x128xf32, #tpu.memory_space<vmem>>, %arg9: memref<1x128xf32, #tpu.memory_space<vmem>>, %arg10: memref<128x128xbf16, #tpu.memory_space<vmem>>, %arg11: memref<1x128xf32, #tpu.memory_space<vmem>>, %arg12: memref<8x512xf32, #tpu.memory_space<vmem>>) attributes {dimension_semantics = [#tpu.dimension_semantics<parallel>], iteration_bounds = array<i64: 1>, scalar_prefetch = 0 : i64, scratch_operands = 0 : i64, tpu.core_type = #tpu.core_type<tc>, window_params = [{transform_indices = @transform_0, window_bounds = array<i64: 8, 1>}, {pipeline_mode = #tpu.pipeline_mode<synchronous>, transform_indices = @transform_1, window_bounds = array<i64: 8, 128>}, {pipeline_mode = #tpu.pipeline_mode<synchronous>, transform_indices = @transform_2, window_bounds = array<i64: 8, 256>}, {pipeline_mode = #tpu.pipeline_mode<synchronous>, transform_indices = @transform_3, window_bounds = array<i64: 128, 512>}, {pipeline_mode = #tpu.pipeline_mode<synchronous>, transform_indices = @transform_4, window_bounds = array<i64: 1, 512>}, {pipeline_mode = #tpu.pipeline_mode<synchronous>, transform_indices = @transform_5, window_bounds = array<i64: 512, 128>}, {pipeline_mode = #tpu.pipeline_mode<synchronous>, transform_indices = @transform_6, window_bounds = array<i64: 1, 128>}, {pipeline_mode = #tpu.pipeline_mode<synchronous>, transform_indices = @transform_7, window_bounds = array<i64: 16, 128>}, {pipeline_mode = #tpu.pipeline_mode<synchronous>, transform_indices = @transform_8, window_bounds = array<i64: 1, 128>}, {pipeline_mode = #tpu.pipeline_mode<synchronous>, transform_indices = @transform_9, window_bounds = array<i64: 128, 128>}, {pipeline_mode = #tpu.pipeline_mode<synchronous>, transform_indices = @transform_10, window_bounds = array<i64: 1, 128>}, {transform_indices = @transform_11, window_bounds = array<i64: 8, 512>}]} {
    %0 = tpu.iota {dimensions = array<i32: 1>} : vector<8x128xi32>
    %c64_i32 = arith.constant 64 : i32
    %1 = vector.broadcast %c64_i32 : i32 to vector<8x128xi32>
    %2 = arith.cmpi slt, %0, %1 : vector<8x128xi32>
    %c64_i32_0 = arith.constant 64 : i32
    %3 = vector.broadcast %c64_i32_0 : i32 to vector<8x128xi32>
    %4 = arith.subi %0, %3 : vector<8x128xi32>
    %5 = arith.select %2, %0, %4 : vector<8x128xi1>, vector<8x128xi32>
    %6 = arith.sitofp %5 : vector<8x128xi32> to vector<8x128xf32>
    %cst = arith.constant -0.146195874 : f32
    %7 = vector.broadcast %cst : f32 to vector<8x128xf32>
    %8 = arith.mulf %6, %7 : vector<8x128xf32>
    %9 = math.exp %8 : vector<8x128xf32>
    %c0 = arith.constant 0 : index
    %c0_1 = arith.constant 0 : index
    %10 = vector.load %arg2[%c0, %c0_1] : memref<8x128xf32, #tpu.memory_space<vmem>>, vector<8x1xf32>
    %11 = vector.broadcast %10 : vector<8x1xf32> to vector<8x128xf32>
    %12 = arith.mulf %11, %9 : vector<8x128xf32>
    %c64_i32_2 = arith.constant 64 : i32
    %13 = vector.broadcast %c64_i32_2 : i32 to vector<8x128xi32>
    %14 = arith.cmpi slt, %0, %13 : vector<8x128xi32>
    %15 = math.sin %12 : vector<8x128xf32>
    %16 = math.cos %12 : vector<8x128xf32>
    %17 = arith.select %14, %15, %16 : vector<8x128xi1>, vector<8x128xf32>
    %18 = arith.truncf %17 : vector<8x128xf32> to vector<8x128xbf16>
    %c0_3 = arith.constant 0 : index
    %c0_4 = arith.constant 0 : index
    %19 = vector.load %arg4[%c0_3, %c0_4] : memref<128x512xbf16, #tpu.memory_space<vmem>>, vector<128x512xbf16>
    %cst_5 = arith.constant dense<0.000000e+00> : vector<8x512xf32>
    %20 = tpu.matmul %18, %19, %cst_5 {dimension_numbers = #tpu.dot_dimension_numbers<[1], [0], [0], [1], [0, 0, 1, 1], [], []>} : vector<8x128xbf16>, vector<128x512xbf16>, vector<8x512xf32> -> vector<8x512xf32>
    %c0_6 = arith.constant 0 : index
    %c0_7 = arith.constant 0 : index
    %21 = vector.load %arg5[%c0_6, %c0_7] : memref<1x512xf32, #tpu.memory_space<vmem>>, vector<1x512xf32>
    %22 = vector.broadcast %21 : vector<1x512xf32> to vector<8x512xf32>
    %23 = arith.addf %20, %22 : vector<8x512xf32>
    %cst_8 = arith.constant 0.000000e+00 : f32
    %24 = vector.broadcast %cst_8 : f32 to vector<8x512xf32>
    %25 = arith.maximumf %23, %24 : vector<8x512xf32>
    %26 = arith.truncf %25 : vector<8x512xf32> to vector<8x512xbf16>
    %c0_9 = arith.constant 0 : index
    %c0_10 = arith.constant 0 : index
    %27 = vector.load %arg6[%c0_9, %c0_10] : memref<512x128xbf16, #tpu.memory_space<vmem>>, vector<512x128xbf16>
    %cst_11 = arith.constant dense<0.000000e+00> : vector<8x128xf32>
    %28 = tpu.matmul %26, %27, %cst_11 {dimension_numbers = #tpu.dot_dimension_numbers<[1], [0], [0], [1], [0, 0, 1, 1], [], []>} : vector<8x512xbf16>, vector<512x128xbf16>, vector<8x128xf32> -> vector<8x128xf32>
    %c0_12 = arith.constant 0 : index
    %c0_13 = arith.constant 0 : index
    %29 = vector.load %arg7[%c0_12, %c0_13] : memref<1x128xf32, #tpu.memory_space<vmem>>, vector<1x128xf32>
    %30 = vector.broadcast %29 : vector<1x128xf32> to vector<8x128xf32>
    %31 = arith.addf %28, %30 : vector<8x128xf32>
    %c0_14 = arith.constant 0 : index
    %c0_15 = arith.constant 0 : index
    %32 = vector.load %arg9[%c0_14, %c0_15] : memref<1x128xf32, #tpu.memory_space<vmem>>, vector<1x128xf32>
    %c0_16 = arith.constant 0 : index
    %c1 = arith.constant 1 : index
    %33 = vector.load %arg2[%c0_16, %c1] : memref<8x128xf32, #tpu.memory_space<vmem>>, vector<8x1xf32>
    %c0_17 = arith.constant 0 : index
    %c0_18 = arith.constant 0 : index
    %34 = vector.load %arg8[%c0_17, %c0_18] : memref<16x128xf32, #tpu.memory_space<vmem>>, vector<1x128xf32>
    %35 = vector.broadcast %33 : vector<8x1xf32> to vector<8x128xf32>
    %36 = vector.broadcast %34 : vector<1x128xf32> to vector<8x128xf32>
    %37 = arith.mulf %35, %36 : vector<8x128xf32>
    %38 = vector.broadcast %32 : vector<1x128xf32> to vector<8x128xf32>
    %39 = arith.addf %38, %37 : vector<8x128xf32>
    %c0_19 = arith.constant 0 : index
    %c2 = arith.constant 2 : index
    %40 = vector.load %arg2[%c0_19, %c2] : memref<8x128xf32, #tpu.memory_space<vmem>>, vector<8x1xf32>
    %c1_20 = arith.constant 1 : index
    %c0_21 = arith.constant 0 : index
    %41 = vector.load %arg8[%c1_20, %c0_21] : memref<16x128xf32, #tpu.memory_space<vmem>>, vector<1x128xf32>
    %42 = vector.broadcast %40 : vector<8x1xf32> to vector<8x128xf32>
    %43 = vector.broadcast %41 : vector<1x128xf32> to vector<8x128xf32>
    %44 = arith.mulf %42, %43 : vector<8x128xf32>
    %45 = arith.addf %39, %44 : vector<8x128xf32>
    %c0_22 = arith.constant 0 : index
    %c3 = arith.constant 3 : index
    %46 = vector.load %arg2[%c0_22, %c3] : memref<8x128xf32, #tpu.memory_space<vmem>>, vector<8x1xf32>
    %c2_23 = arith.constant 2 : index
    %c0_24 = arith.constant 0 : index
    %47 = vector.load %arg8[%c2_23, %c0_24] : memref<16x128xf32, #tpu.memory_space<vmem>>, vector<1x128xf32>
    %48 = vector.broadcast %46 : vector<8x1xf32> to vector<8x128xf32>
    %49 = vector.broadcast %47 : vector<1x128xf32> to vector<8x128xf32>
    %50 = arith.mulf %48, %49 : vector<8x128xf32>
    %51 = arith.addf %45, %50 : vector<8x128xf32>
    %c0_25 = arith.constant 0 : index
    %c4 = arith.constant 4 : index
    %52 = vector.load %arg2[%c0_25, %c4] : memref<8x128xf32, #tpu.memory_space<vmem>>, vector<8x1xf32>
    %c3_26 = arith.constant 3 : index
    %c0_27 = arith.constant 0 : index
    %53 = vector.load %arg8[%c3_26, %c0_27] : memref<16x128xf32, #tpu.memory_space<vmem>>, vector<1x128xf32>
    %54 = vector.broadcast %52 : vector<8x1xf32> to vector<8x128xf32>
    %55 = vector.broadcast %53 : vector<1x128xf32> to vector<8x128xf32>
    %56 = arith.mulf %54, %55 : vector<8x128xf32>
    %57 = arith.addf %51, %56 : vector<8x128xf32>
    %c0_28 = arith.constant 0 : index
    %c5 = arith.constant 5 : index
    %58 = vector.load %arg2[%c0_28, %c5] : memref<8x128xf32, #tpu.memory_space<vmem>>, vector<8x1xf32>
    %c4_29 = arith.constant 4 : index
    %c0_30 = arith.constant 0 : index
    %59 = vector.load %arg8[%c4_29, %c0_30] : memref<16x128xf32, #tpu.memory_space<vmem>>, vector<1x128xf32>
    %60 = vector.broadcast %58 : vector<8x1xf32> to vector<8x128xf32>
    %61 = vector.broadcast %59 : vector<1x128xf32> to vector<8x128xf32>
    %62 = arith.mulf %60, %61 : vector<8x128xf32>
    %63 = arith.addf %57, %62 : vector<8x128xf32>
    %c0_31 = arith.constant 0 : index
    %c6 = arith.constant 6 : index
    %64 = vector.load %arg2[%c0_31, %c6] : memref<8x128xf32, #tpu.memory_space<vmem>>, vector<8x1xf32>
    %c5_32 = arith.constant 5 : index
    %c0_33 = arith.constant 0 : index
    %65 = vector.load %arg8[%c5_32, %c0_33] : memref<16x128xf32, #tpu.memory_space<vmem>>, vector<1x128xf32>
    %66 = vector.broadcast %64 : vector<8x1xf32> to vector<8x128xf32>
    %67 = vector.broadcast %65 : vector<1x128xf32> to vector<8x128xf32>
    %68 = arith.mulf %66, %67 : vector<8x128xf32>
    %69 = arith.addf %63, %68 : vector<8x128xf32>
    %c0_34 = arith.constant 0 : index
    %c7 = arith.constant 7 : index
    %70 = vector.load %arg2[%c0_34, %c7] : memref<8x128xf32, #tpu.memory_space<vmem>>, vector<8x1xf32>
    %c6_35 = arith.constant 6 : index
    %c0_36 = arith.constant 0 : index
    %71 = vector.load %arg8[%c6_35, %c0_36] : memref<16x128xf32, #tpu.memory_space<vmem>>, vector<1x128xf32>
    %72 = vector.broadcast %70 : vector<8x1xf32> to vector<8x128xf32>
    %73 = vector.broadcast %71 : vector<1x128xf32> to vector<8x128xf32>
    %74 = arith.mulf %72, %73 : vector<8x128xf32>
    %75 = arith.addf %69, %74 : vector<8x128xf32>
    %c0_37 = arith.constant 0 : index
    %c8 = arith.constant 8 : index
    %76 = vector.load %arg2[%c0_37, %c8] : memref<8x128xf32, #tpu.memory_space<vmem>>, vector<8x1xf32>
    %c7_38 = arith.constant 7 : index
    %c0_39 = arith.constant 0 : index
    %77 = vector.load %arg8[%c7_38, %c0_39] : memref<16x128xf32, #tpu.memory_space<vmem>>, vector<1x128xf32>
    %78 = vector.broadcast %76 : vector<8x1xf32> to vector<8x128xf32>
    %79 = vector.broadcast %77 : vector<1x128xf32> to vector<8x128xf32>
    %80 = arith.mulf %78, %79 : vector<8x128xf32>
    %81 = arith.addf %75, %80 : vector<8x128xf32>
    %c0_40 = arith.constant 0 : index
    %c9 = arith.constant 9 : index
    %82 = vector.load %arg2[%c0_40, %c9] : memref<8x128xf32, #tpu.memory_space<vmem>>, vector<8x1xf32>
    %c8_41 = arith.constant 8 : index
    %c0_42 = arith.constant 0 : index
    %83 = vector.load %arg8[%c8_41, %c0_42] : memref<16x128xf32, #tpu.memory_space<vmem>>, vector<1x128xf32>
    %84 = vector.broadcast %82 : vector<8x1xf32> to vector<8x128xf32>
    %85 = vector.broadcast %83 : vector<1x128xf32> to vector<8x128xf32>
    %86 = arith.mulf %84, %85 : vector<8x128xf32>
    %87 = arith.addf %81, %86 : vector<8x128xf32>
    %cst_43 = arith.constant 0.000000e+00 : f32
    %88 = vector.broadcast %cst_43 : f32 to vector<8x128xf32>
    %89 = arith.maximumf %87, %88 : vector<8x128xf32>
    %90 = arith.truncf %89 : vector<8x128xf32> to vector<8x128xbf16>
    %c0_44 = arith.constant 0 : index
    %c0_45 = arith.constant 0 : index
    %91 = vector.load %arg10[%c0_44, %c0_45] : memref<128x128xbf16, #tpu.memory_space<vmem>>, vector<128x128xbf16>
    %cst_46 = arith.constant dense<0.000000e+00> : vector<8x128xf32>
    %92 = tpu.matmul %90, %91, %cst_46 {dimension_numbers = #tpu.dot_dimension_numbers<[1], [0], [0], [1], [0, 0, 1, 1], [], []>} : vector<8x128xbf16>, vector<128x128xbf16>, vector<8x128xf32> -> vector<8x128xf32>
    %c0_47 = arith.constant 0 : index
    %c0_48 = arith.constant 0 : index
    %93 = vector.load %arg11[%c0_47, %c0_48] : memref<1x128xf32, #tpu.memory_space<vmem>>, vector<1x128xf32>
    %94 = vector.broadcast %93 : vector<1x128xf32> to vector<8x128xf32>
    %95 = arith.addf %92, %94 : vector<8x128xf32>
    %c0_49 = arith.constant 0 : index
    %c0_50 = arith.constant 0 : index
    %96 = vector.load %arg3[%c0_49, %c0_50] : memref<8x256xf32, #tpu.memory_space<vmem>>, vector<8x256xf32>
    %97 = tpu.concatenate %96, %31, %95 in 1 : vector<8x256xf32>, vector<8x128xf32>, vector<8x128xf32> -> vector<8x512xf32>
    %c0_51 = arith.constant 0 : index
    %c0_52 = arith.constant 0 : index
    %98 = vector.load %arg1[%c0_51, %c0_52] : memref<8x1xi32, #tpu.memory_space<vmem>>, vector<8x1xi32>
    %cst_53 = arith.constant 0.000000e+00 : f32
    %99 = vector.broadcast %cst_53 : f32 to vector<8x512xf32>
    %c0_i32 = arith.constant 0 : i32
    %100 = vector.broadcast %c0_i32 : i32 to vector<8x1xi32>
    %101 = arith.cmpi eq, %98, %100 : vector<8x1xi32>
    %102 = vector.extract_strided_slice %97 {offsets = [0, 0], sizes = [1, 512], strides = [1, 1]} : vector<8x512xf32> to vector<1x512xf32>
    %103 = vector.shape_cast %101 : vector<8x1xi1> to vector<8x1xi1>
    %104 = vector.broadcast %103 : vector<8x1xi1> to vector<8x512xi1>
    %105 = vector.shape_cast %102 : vector<1x512xf32> to vector<1x512xf32>
    %106 = vector.broadcast %105 : vector<1x512xf32> to vector<8x512xf32>
    %107 = arith.select %104, %106, %99 : vector<8x512xi1>, vector<8x512xf32>
    %c1_i32 = arith.constant 1 : i32
    %108 = vector.broadcast %c1_i32 : i32 to vector<8x1xi32>
    %109 = arith.cmpi eq, %98, %108 : vector<8x1xi32>
    %110 = vector.extract_strided_slice %97 {offsets = [1, 0], sizes = [1, 512], strides = [1, 1]} : vector<8x512xf32> to vector<1x512xf32>
    %111 = vector.shape_cast %109 : vector<8x1xi1> to vector<8x1xi1>
    %112 = vector.broadcast %111 : vector<8x1xi1> to vector<8x512xi1>
    %113 = vector.shape_cast %110 : vector<1x512xf32> to vector<1x512xf32>
    %114 = vector.broadcast %113 : vector<1x512xf32> to vector<8x512xf32>
    %115 = arith.select %112, %114, %107 : vector<8x512xi1>, vector<8x512xf32>
    %c2_i32 = arith.constant 2 : i32
    %116 = vector.broadcast %c2_i32 : i32 to vector<8x1xi32>
    %117 = arith.cmpi eq, %98, %116 : vector<8x1xi32>
    %118 = vector.extract_strided_slice %97 {offsets = [2, 0], sizes = [1, 512], strides = [1, 1]} : vector<8x512xf32> to vector<1x512xf32>
    %119 = vector.shape_cast %117 : vector<8x1xi1> to vector<8x1xi1>
    %120 = vector.broadcast %119 : vector<8x1xi1> to vector<8x512xi1>
    %121 = vector.shape_cast %118 : vector<1x512xf32> to vector<1x512xf32>
    %122 = vector.broadcast %121 : vector<1x512xf32> to vector<8x512xf32>
    %123 = arith.select %120, %122, %115 : vector<8x512xi1>, vector<8x512xf32>
    %c3_i32 = arith.constant 3 : i32
    %124 = vector.broadcast %c3_i32 : i32 to vector<8x1xi32>
    %125 = arith.cmpi eq, %98, %124 : vector<8x1xi32>
    %126 = vector.extract_strided_slice %97 {offsets = [3, 0], sizes = [1, 512], strides = [1, 1]} : vector<8x512xf32> to vector<1x512xf32>
    %127 = vector.shape_cast %125 : vector<8x1xi1> to vector<8x1xi1>
    %128 = vector.broadcast %127 : vector<8x1xi1> to vector<8x512xi1>
    %129 = vector.shape_cast %126 : vector<1x512xf32> to vector<1x512xf32>
    %130 = vector.broadcast %129 : vector<1x512xf32> to vector<8x512xf32>
    %131 = arith.select %128, %130, %123 : vector<8x512xi1>, vector<8x512xf32>
    %c4_i32 = arith.constant 4 : i32
    %132 = vector.broadcast %c4_i32 : i32 to vector<8x1xi32>
    %133 = arith.cmpi eq, %98, %132 : vector<8x1xi32>
    %134 = vector.extract_strided_slice %97 {offsets = [4, 0], sizes = [1, 512], strides = [1, 1]} : vector<8x512xf32> to vector<1x512xf32>
    %135 = vector.shape_cast %133 : vector<8x1xi1> to vector<8x1xi1>
    %136 = vector.broadcast %135 : vector<8x1xi1> to vector<8x512xi1>
    %137 = vector.shape_cast %134 : vector<1x512xf32> to vector<1x512xf32>
    %138 = vector.broadcast %137 : vector<1x512xf32> to vector<8x512xf32>
    %139 = arith.select %136, %138, %131 : vector<8x512xi1>, vector<8x512xf32>
    %c5_i32 = arith.constant 5 : i32
    %140 = vector.broadcast %c5_i32 : i32 to vector<8x1xi32>
    %141 = arith.cmpi eq, %98, %140 : vector<8x1xi32>
    %142 = vector.extract_strided_slice %97 {offsets = [5, 0], sizes = [1, 512], strides = [1, 1]} : vector<8x512xf32> to vector<1x512xf32>
    %143 = vector.shape_cast %141 : vector<8x1xi1> to vector<8x1xi1>
    %144 = vector.broadcast %143 : vector<8x1xi1> to vector<8x512xi1>
    %145 = vector.shape_cast %142 : vector<1x512xf32> to vector<1x512xf32>
    %146 = vector.broadcast %145 : vector<1x512xf32> to vector<8x512xf32>
    %147 = arith.select %144, %146, %139 : vector<8x512xi1>, vector<8x512xf32>
    %c6_i32 = arith.constant 6 : i32
    %148 = vector.broadcast %c6_i32 : i32 to vector<8x1xi32>
    %149 = arith.cmpi eq, %98, %148 : vector<8x1xi32>
    %150 = vector.extract_strided_slice %97 {offsets = [6, 0], sizes = [1, 512], strides = [1, 1]} : vector<8x512xf32> to vector<1x512xf32>
    %151 = vector.shape_cast %149 : vector<8x1xi1> to vector<8x1xi1>
    %152 = vector.broadcast %151 : vector<8x1xi1> to vector<8x512xi1>
    %153 = vector.shape_cast %150 : vector<1x512xf32> to vector<1x512xf32>
    %154 = vector.broadcast %153 : vector<1x512xf32> to vector<8x512xf32>
    %155 = arith.select %152, %154, %147 : vector<8x512xi1>, vector<8x512xf32>
    %c7_i32 = arith.constant 7 : i32
    %156 = vector.broadcast %c7_i32 : i32 to vector<8x1xi32>
    %157 = arith.cmpi eq, %98, %156 : vector<8x1xi32>
    %158 = vector.extract_strided_slice %97 {offsets = [7, 0], sizes = [1, 512], strides = [1, 1]} : vector<8x512xf32> to vector<1x512xf32>
    %159 = vector.shape_cast %157 : vector<8x1xi1> to vector<8x1xi1>
    %160 = vector.broadcast %159 : vector<8x1xi1> to vector<8x512xi1>
    %161 = vector.shape_cast %158 : vector<1x512xf32> to vector<1x512xf32>
    %162 = vector.broadcast %161 : vector<1x512xf32> to vector<8x512xf32>
    %163 = arith.select %160, %162, %155 : vector<8x512xi1>, vector<8x512xf32>
    %c0_54 = arith.constant 0 : index
    %c0_55 = arith.constant 0 : index
    %164 = vector.load %arg12[%c0_54, %c0_55] : memref<8x512xf32, #tpu.memory_space<vmem>>, vector<8x512xf32>
    tpu.vector_store %arg12[%c0_54, %c0_55], %163 {strides = array<i32>} : memref<8x512xf32, #tpu.memory_space<vmem>>, vector<8x512xf32>,
    return
  }
  func.func @transform_0(%arg0: i32) -> (i32, i32) {
    %c0_i32 = arith.constant 0 : i32
    %c0_i32_0 = arith.constant 0 : i32
    return %arg0, %c0_i32 : i32, i32
  }
  func.func @transform_1(%arg0: i32) -> (i32, i32) {
    %c0_i32 = arith.constant 0 : i32
    %c0_i32_0 = arith.constant 0 : i32
    %c0_i32_1 = arith.constant 0 : i32
    return %c0_i32, %c0_i32_0 : i32, i32
  }
  func.func @transform_2(%arg0: i32) -> (i32, i32) {
    %c0_i32 = arith.constant 0 : i32
    %c0_i32_0 = arith.constant 0 : i32
    %c0_i32_1 = arith.constant 0 : i32
    return %c0_i32, %c0_i32_0 : i32, i32
  }
  func.func @transform_3(%arg0: i32) -> (i32, i32) {
    %c0_i32 = arith.constant 0 : i32
    %c0_i32_0 = arith.constant 0 : i32
    %c0_i32_1 = arith.constant 0 : i32
    return %c0_i32, %c0_i32_0 : i32, i32
  }
  func.func @transform_4(%arg0: i32) -> (i32, i32) {
    %c0_i32 = arith.constant 0 : i32
    %c0_i32_0 = arith.constant 0 : i32
    %c0_i32_1 = arith.constant 0 : i32
    return %c0_i32, %c0_i32_0 : i32, i32
  }
  func.func @transform_5(%arg0: i32) -> (i32, i32) {
    %c0_i32 = arith.constant 0 : i32
    %c0_i32_0 = arith.constant 0 : i32
    %c0_i32_1 = arith.constant 0 : i32
    return %c0_i32, %c0_i32_0 : i32, i32
  }
  func.func @transform_6(%arg0: i32) -> (i32, i32) {
    %c0_i32 = arith.constant 0 : i32
    %c0_i32_0 = arith.constant 0 : i32
    %c0_i32_1 = arith.constant 0 : i32
    return %c0_i32, %c0_i32_0 : i32, i32
  }
  func.func @transform_7(%arg0: i32) -> (i32, i32) {
    %c0_i32 = arith.constant 0 : i32
    %c0_i32_0 = arith.constant 0 : i32
    %c0_i32_1 = arith.constant 0 : i32
    return %c0_i32, %c0_i32_0 : i32, i32
  }
  func.func @transform_8(%arg0: i32) -> (i32, i32) {
    %c0_i32 = arith.constant 0 : i32
    %c0_i32_0 = arith.constant 0 : i32
    %c0_i32_1 = arith.constant 0 : i32
    return %c0_i32, %c0_i32_0 : i32, i32
  }
  func.func @transform_9(%arg0: i32) -> (i32, i32) {
    %c0_i32 = arith.constant 0 : i32
    %c0_i32_0 = arith.constant 0 : i32
    %c0_i32_1 = arith.constant 0 : i32
    return %c0_i32, %c0_i32_0 : i32, i32
  }
  func.func @transform_10(%arg0: i32) -> (i32, i32) {
    %c0_i32 = arith.constant 0 : i32
    %c0_i32_0 = arith.constant 0 : i32
    %c0_i32_1 = arith.constant 0 : i32
    return %c0_i32, %c0_i32_0 : i32, i32
  }
  func.func @transform_11(%arg0: i32) -> (i32, i32) {
    %c0_i32 = arith.constant 0 : i32
    %c0_i32_0 = arith.constant 0 : i32
    return %arg0, %c0_i32 : i32, i32
  }
}

</mosaic_0001>

<bundles_post_ra>
// kernel: tpu_custom_call.1
= control target key start
LH: loop header
LB: loop body
LE: loop exit
PB: predicated region body
PF: predicated region fallthrough
CT: control target
= control target key end

     0   :  { %16 = vsyncpa [#allocation3], 0  ;;  %s2222_s0 = inlined_call_operand.vmem [shape: s32[8,1], index: 0, kind: input, shape index: {}]   ;;  %s2223_s1 = inlined_call_operand.vmem [shape: f32[8,128], index: 1, kind: input, shape index: {}]   ;;  %s2224_s2 = inlined_call_operand.hbm [shape: f32[8,256], index: 2, kind: input, shape index: {}]   ;;  %s2225_s3 = inlined_call_operand.hbm [shape: bf16[128,512], index: 3, kind: input, shape index: {}]   ;;  %s2226_s4 = inlined_call_operand.vmem [shape: f32[1,512], index: 4, kind: input, shape index: {}]   ;;  %s2227_s5 = inlined_call_operand.hbm [shape: bf16[512,128], index: 5, kind: input, shape index: {}]   ;;  %s2228_s6 = inlined_call_operand.vmem [shape: f32[1,128], index: 6, kind: input, shape index: {}]   ;;  %s2229_s7 = inlined_call_operand.hbm [shape: f32[16,128], index: 7, kind: input, shape index: {}]   ;;  %s2230_s8 = inlined_call_operand.vmem [shape: f32[1,128], index: 8, kind: input, shape index: {}]   ;;  %s2231_s9 = inlined_call_operand.hbm [shape: bf16[128,128], index: 9, kind: input, shape index: {}]   ;;  %s2232_s10 = inlined_call_operand.vmem [shape: f32[1,128], index: 10, kind: input, shape index: {}]   ;;  %s2233_s11 = inlined_call_operand.hbm [shape: f32[8,512], index: 11, kind: output, shape index: {}]  }
   0x1   :  { %17 = vsyncpa [#allocation6], 0 }
   0x2   :  { %18 = vsyncpa [#allocation9], 0  ;;  %s39_s19 = sshll.u32 %s2225_s3, 4  ;;  %s40_s19 = int_to_ptr.hbm [resolvable:$true] %s39_s19 }
   0x3   :  { %19 = vsyncpa [#allocation4], 0  ;;  %s1887_s20 = smov [#allocation5]   ;;  %s69_s24 = sshll.u32 %s2229_s7, 4  ;;  %s70_s24 = int_to_ptr.hbm [resolvable:$true] %s69_s24 }
   0x4   :  { %s41_s21 = sshll.u32 %s1887_s20, 4  ;;  %s1888_s25 = smov 256   ;;  %s42_s21 = int_to_ptr.vmem [resolvable:$true] %s41_s21 }
   0x5   :  { %s1889_s26 = smov 16   ;;  %s1890_s27 = smov [#allocation8]  }
   0x6   :  { %47 = dma.hbm_to_vmem [thread:$0]  %s40_s19, 4096, %s42_s21, [#allocation6], %s1888_s25, %s1888_s25, %s1889_s26  }
   0x7   :  { %s71_s28 = sshll.u32 %s1890_s27, 4  ;;  %s1891_s29 = smov 128   ;;  %s72_s28 = int_to_ptr.vmem [resolvable:$true] %s71_s28 }
   0x8   :  { %s1892_s30 = smov 8   ;;  %s29_s13 = sshll.u32 %s2224_s2, 4  ;;  %s30_s13 = int_to_ptr.hbm [resolvable:$true] %s29_s13 }
   0x9   :  { %77 = dma.hbm_to_vmem [thread:$0]  %s70_s24, 256, %s72_s28, [#allocation9], %s1891_s29, %s1891_s29, %s1892_s30  }
   0xa   :  { %s1893_s14 = smov [#allocation2]   ;;  %s54_s17 = sshll.u32 %s2227_s5, 4  ;;  %s55_s17 = int_to_ptr.hbm [resolvable:$true] %s54_s17 }
   0xb   :  { %s31_s15 = sshll.u32 %s1893_s14, 4  ;;  %s1894_s18 = smov [#allocation7]   ;;  %s32_s15 = int_to_ptr.vmem [resolvable:$true] %s31_s15 }
   0xc   :  { %34 = dma.hbm_to_vmem [thread:$0]  %s30_s13, 256, %s32_s15, [#allocation3]  }
   0xd   :  { %s56_s19 = sshll.u32 %s1894_s18, 4  ;;  %s1895_s20 = smov 64   ;;  %s57_s19 = int_to_ptr.vmem [resolvable:$true] %s56_s19 }
   0xe   :  { %s1896_s21 = smov 4   ;;  %s84_s2 = sshll.u32 %s2231_s9, 4  ;;  %s85_s2 = int_to_ptr.hbm [resolvable:$true] %s84_s2 }
   0xf   :  { %62 = dma.hbm_to_vmem [thread:$0]  %s55_s17, 4096, %s57_s19, [#allocation6], %s1895_s20, %s1895_s20, %s1896_s21  }
  0x10   :  { %s1897_s24 = smov [#allocation10]  }
  0x11   :  { %s86_s25 = sshll.u32 %s1897_s24, 4  ;;  %s87_s25 = int_to_ptr.vmem [resolvable:$true] %s86_s25 }
  0x12   :  { %92 = dma.hbm_to_vmem [thread:$0]  %s85_s2, 1024, %s87_s25, [#allocation9], %s1895_s20, %s1895_s20, %s1896_s21  }
  0x13   :  { %1879 = dma.done.wait [#allocation3], 256  }
  0x14   :  { %1880 = vsyncadd [#allocation3], 4294967040 }
  0x15   :  { %1881 = dma.done.wait [#allocation6], 8192  }
  0x16   :  { %1882 = vsyncadd [#allocation6], 4294959104 }
  0x17   :  { %1883 = dma.done.wait [#allocation9], 1280  }
  0x18   :  { %1884 = vsyncadd [#allocation9], 4294966016  ;;  %v1898_v0 = vmov 0   ;;  %v1994_v1 = vld [vmem:[%s2223_s1] sm:$0xff]  ;;  %v115_v2 = vlaneseq  ;;  %v1899_v23 = vmov 683565275  }
  0x19   :  { %1708 = vset.pattern.permute.xlu0 %v1898_v0  ;;  %v1900_v25 = vmov 2475754826   ;;  %v1901_v28 = vmov 2131351028   ;;  %v1902_v31 = vmov 2102212464  }
  0x1a   :  { %127 = vperm.xlu0 %1708, %v1994_v1   ;;  %v1997_v3 = vand.u32 127, %v115_v2  ;;  %v1903_v34 = vmov 920167782   ;;  %v1904_v37 = vmov 1326507024   ;;  %s1301_s14 = sshll.u32 %s2233_s11, 4  ;;  %s1302_s14 = int_to_ptr.hbm [resolvable:$true] %s1301_s14 }
  0x1c   :  { %v1313_v4 = vadd.s32 4294967232, %v1997_v3  ;;  %vm117_vm0 = vcmp.lt.s32.totalorder %v1997_v3, 64 }
  0x1e   :  { %v119_v5 = vsel %vm117_vm0, %v1997_v3, %v1313_v4  ;;  %v1662_v3 = vld [vmem:[#allocation7 + $0xb0] sm:$0xff] }
  0x1f   :  { %v120_v6 = vcvt.s32.f32 %v119_v5 }
  0x21   :  { %v121_v7 = vmul.f32 -0.14619587, %v120_v6 }
  0x23   :  { %v122_v8 = vmul.f32 1.442695, %v121_v7 }
  0x25   :  { %1733 = vpow2.f32 %v122_v8 }
  0x2b   :  { %v1734_v9 = vpop.eup %1733 }
  0x8c   :  { %v128_v10 = vpop.permute.xlu0 %127 }
  0x8d   :  { %v2004_v11 = vmul.f32 %v1734_v9, %v128_v10 }
  0x8f   :  { %v134_v12 = vand.u32 2139095040, %v2004_v11  ;;  %v131_v15 = vand.u32 2147483647, %v2004_v11  ;;  %vm133_vm13 = vcmp.lt.s32.totalorder %v2004_v11, 0 }
  0x91   :  { %v135_v13 = vshrl.u32 %v134_v12, 23  ;;  %v138_v17 = vand.u32 8388607, %v131_v15  ;;  %vm2085_vm14 = vcmp.le.f32.partialorder %v131_v15, 0.7853982 }
  0x93   :  { %v1314_v14 = vadd.s32 4294967169, %v135_v13  ;;  %v139_v21 = vor.u32 8388608, %v138_v17 }
  0x95   :  { %v141_v16 = vadd.s32 1, %v1314_v14  ;;  %v2021_v44 = vshll.u32 %v139_v21, 8 }
  0x97   :  { %vm142_vm1 = vcmp.gt.s32.totalorder %v141_v16, 0  ;;  %v180_v53 = vand.u32 65535, %v2021_v44  ;;  %v181_v54 = vshrl.u32 %v2021_v44, 16 }
  0x98   :  { %v143_v18 = vsel %vm142_vm1, %v141_v16, 0 }
  0x99   :  { %v145_v19 = vand.u32 31, %v143_v18  ;;  %v2012_v22 = vshrl.u32 %v143_v18, 5 }
  0x9b   :  { %v2010_v20 = vsub.s32 32, %v145_v19  ;;  %v148_v24 = vshll.u32 %v1899_v23, %v145_v19  ;;  %v151_v26 = vshll.u32 %v1900_v25, %v145_v19  ;;  %v154_v30 = vshll.u32 %v1901_v28, %v145_v19 }
  0x9c   :  { %v157_v33 = vshll.u32 %v1902_v31, %v145_v19  ;;  %v160_v36 = vshll.u32 %v1903_v34, %v145_v19  ;;  %vm163_vm2 = vcmp.lt.s32.totalorder %v2012_v22, 1  ;;  %vm166_vm3 = vcmp.lt.s32.totalorder %v2012_v22, 4 }
  0x9d   :  { %v149_v27 = vshrl.u32 %v1900_v25, %v2010_v20  ;;  %v152_v29 = vshrl.u32 %v1901_v28, %v2010_v20  ;;  %v155_v32 = vshrl.u32 %v1902_v31, %v2010_v20  ;;  %v158_v35 = vshrl.u32 %v1903_v34, %v2010_v20 }
  0x9e   :  { %v161_v38 = vshrl.u32 %v1904_v37, %v2010_v20  ;;  %vm165_vm4 = vcmp.lt.s32.totalorder %v2012_v22, 3  ;;  %vm164_vm5 = vcmp.lt.s32.totalorder %v2012_v22, 2  ;;  %v147_v21 = vshrl.u32 %v1899_v23, %v2010_v20  ;;  %v1434_v20 = vld [vmem:[#allocation5 + $0xe0] sm:$0xf]  ;;  %v1638_v23 = vld [vmem:[#allocation5 + $0xec] sm:$0xf0] }
  0x9f   :  { %v150_v39 = vor.u32 %v149_v27, %v148_v24  ;;  %v153_v40 = vor.u32 %v152_v29, %v151_v26  ;;  %v156_v41 = vor.u32 %v155_v32, %v154_v30  ;;  %v159_v42 = vor.u32 %v158_v35, %v157_v33  ;;  %v1636_v37 = vld [vmem:[#allocation5 + $0xe4] sm:$0xf]  ;;  %v1418_v22 = vld [vmem:[#allocation5 + $0xc0] sm:$0xf] }
  0xa0   :  { %v162_v43 = vor.u32 %v161_v38, %v160_v36 }
  0xa1   :  { %v171_v45 = vsel %vm163_vm2, %v150_v39, %v153_v40  ;;  %v175_v46 = vsel %vm163_vm2, %v153_v40, %v156_v41  ;;  %v172_v47 = vsel %vm166_vm3, %v159_v42, 920167782  ;;  %v168_v17 = vsel %vm166_vm3, %v156_v41, 2102212464 }
  0xa2   :  { %v176_v48 = vsel %vm166_vm3, %v162_v43, 1326507024  ;;  %v173_v49 = vsel %vm165_vm4, %v156_v41, %v172_v47  ;;  %v167_v29 = vsel %vm163_vm2, %v147_v21, %v150_v39  ;;  %v169_v30 = vsel %vm165_vm4, %v153_v40, %v168_v17  ;;  %v1436_v39 = vld [vmem:[#allocation5 + $0xf0] sm:$0xf0]  ;;  %v1442_v43 = vld [vmem:[#allocation5 + $0xe8] sm:$0xf] }
  0xa3   :  { %v177_v50 = vsel %vm165_vm4, %v159_v42, %v176_v48  ;;  %v174_v51 = vsel %vm164_vm5, %v171_v45, %v173_v49  ;;  %v170_v38 = vsel %vm164_vm5, %v167_v29, %v169_v30  ;;  %v1435_v42 = vor.u32 %v1638_v23, %v1434_v20  ;;  %v1639_v45 = vld [vmem:[#allocation5 + $0xf4] sm:$0xf0]  ;;  %v1637_v47 = vld [vmem:[#allocation5 + $0xec] sm:$0xf]  ;;  %v1444_v48 = vld [vmem:[#allocation5 + $0xf8] sm:$0xf0] }
  0xa4   :  { %v178_v52 = vsel %vm164_vm5, %v175_v46, %v177_v50  ;;  %v204_v57 = vand.u32 65535, %v174_v51  ;;  %v205_v58 = vshrl.u32 %v174_v51, 16  ;;  %v1439_v40 = vor.u32 %v1636_v37, %v1436_v39  ;;  %v1412_v17 = vld [vmem:[#allocation5 + $0xb8] sm:$0xf0]  ;;  %v1386_v21 = vld [vmem:[#allocation5 + $0x80] sm:$0xf] }
  0xa5   :  { %v182_v55 = vand.u32 65535, %v178_v52  ;;  %v183_v56 = vshrl.u32 %v178_v52, 16  ;;  %v1443_v46 = vor.u32 %v1639_v45, %v1442_v43  ;;  %644 = vmatpush.bf16.msra.mxu0 %v1435_v42  ;;  %v1447_v50 = vor.u32 %v1637_v47, %v1444_v48  ;;  %v1634_v52 = vld [vmem:[#allocation5 + $0xcc] sm:$0xf0]  ;;  %v1370_v37 = vld [vmem:[#allocation5 + $0x60] sm:$0xf] }
  0xa6   :  { %v207_v61 = vmul.u32 %v205_v58, %v180_v53  ;;  %v208_v62 = vmul.u32 %v204_v57, %v181_v54  ;;  %v206_v5 = vmul.u32 %v204_v57, %v180_v53  ;;  %v209_v9 = vmul.u32 %v205_v58, %v181_v54  ;;  %657 = vmatpush.bf16.msra.mxu1 %v1439_v40  ;;  %v1426_v57 = vld [vmem:[#allocation5 + $0xc8] sm:$0xf]  ;;  %v1635_v58 = vld [vmem:[#allocation5 + $0xd4] sm:$0xf0]  ;;  %v1372_v45 = vld [vmem:[#allocation5 + $0x70] sm:$0xf0] }
  0xa7   :  { %v185_v59 = vmul.u32 %v183_v56, %v180_v53  ;;  %v186_v60 = vmul.u32 %v182_v55, %v181_v54  ;;  %v184_v63 = vmul.u32 %v182_v55, %v180_v53  ;;  %v187_v4 = vmul.u32 %v183_v56, %v181_v54  ;;  %670 = vmatpush.bf16.msra.mxu2 %v1443_v46  ;;  %v1632_v53 = vld [vmem:[#allocation5 + $0xc4] sm:$0xf]  ;;  %v1420_v56 = vld [vmem:[#allocation5 + $0xd0] sm:$0xf0]  ;;  %v1378_v40 = vld [vmem:[#allocation5 + $0x68] sm:$0xf] }
  0xa8   :  { %v210_v6 = vshll.u32 %v207_v61, 16  ;;  %v212_v12 = vshll.u32 %v208_v62, 16  ;;  %v211_v27 = vshrl.u32 %v207_v61, 16  ;;  %v213_v33 = vshrl.u32 %v208_v62, 16  ;;  %683 = vmatpush.bf16.msra.mxu3 %v1447_v50  ;;  %v1633_v62 = vld [vmem:[#allocation5 + $0xcc] sm:$0xf] }
  0xa9   :  { %v188_v2 = vshll.u32 %v185_v59, 16  ;;  %v190_v7 = vshll.u32 %v186_v60, 16  ;;  %v189_v24 = vshrl.u32 %v185_v59, 16  ;;  %v191_v31 = vshrl.u32 %v186_v60, 16  ;;  %v1623_v48 = vld [vmem:[#allocation5 + $0x74] sm:$0xf0] }
  0xaa   :  { %vm214_vm7 = vc.u32 %v206_v5, %v210_v6  ;;  %v216_v13 = vadd.s32 %v210_v6, %v206_v5  ;;  %v224_v51 = vmul.u32 %v2021_v44, %v170_v38  ;;  %v1419_v55 = vor.u32 %v1634_v52, %v1418_v22  ;;  %v1402_v44 = vld [vmem:[#allocation5 + $0xa0] sm:$0xf]  ;;  %v1630_v5 = vld [vmem:[#allocation5 + $0xac] sm:$0xf0]  ;;  %v1380_v50 = vld [vmem:[#allocation5 + $0x78] sm:$0xf0] }
  0xab   :  { %vm192_vm6 = vc.u32 %v184_v63, %v188_v2  ;;  %v194_v8 = vadd.s32 %v188_v2, %v184_v63  ;;  %v215_v16 = vsel %vm214_vm7, 1, %v1898_v0  ;;  %v1423_v60 = vor.u32 %v1632_v53, %v1420_v56  ;;  %v1428_v63 = vld [vmem:[#allocation5 + $0xd8] sm:$0xf0]  ;;  %v1622_v38 = vld [vmem:[#allocation5 + $0x6c] sm:$0xf0] }
  0xac   :  { %v193_v10 = vsel %vm192_vm6, 1, %v1898_v0  ;;  %v217_v19 = vadd.s32 %v215_v16, %v209_v9  ;;  %vm218_vm9 = vc.u32 %v216_v13, %v212_v12  ;;  %v2058_v36 = vadd.s32 %v216_v13, %v212_v12  ;;  %645 = vmatpush.bf16.msra.mxu0 %v1419_v55  ;;  %v1410_v9 = vld [vmem:[#allocation5 + $0xa8] sm:$0xf]  ;;  %v1631_v13 = vld [vmem:[#allocation5 + $0xb4] sm:$0xf0] }
  0xad   :  { %v195_v14 = vadd.s32 %v193_v10, %v187_v4  ;;  %vm196_vm8 = vc.u32 %v194_v8, %v190_v7  ;;  %v219_v26 = vsel %vm218_vm9, 1, %v1898_v0  ;;  %v1427_v61 = vor.u32 %v1635_v58, %v1426_v57  ;;  %658 = vmatpush.bf16.msra.mxu1 %v1423_v60  ;;  %v1628_v7 = vld [vmem:[#allocation5 + $0xa4] sm:$0xf]  ;;  %v1404_v8 = vld [vmem:[#allocation5 + $0xb0] sm:$0xf0] }
  0xae   :  { %v197_v18 = vsel %vm196_vm8, 1, %v1898_v0  ;;  %v221_v28 = vadd.s32 %v219_v26, %v217_v19  ;;  %v1431_v2 = vor.u32 %v1633_v62, %v1428_v63  ;;  %v1403_v6 = vor.u32 %v1630_v5, %v1402_v44  ;;  %v1624_v26 = vld [vmem:[#allocation5 + $0x84] sm:$0xf]  ;;  %v1354_v52 = vld [vmem:[#allocation5 + $0x40] sm:$0xf] }
  0xaf   :  { %v199_v25 = vadd.s32 %v197_v18, %v195_v14  ;;  %671 = vmatpush.bf16.msra.mxu2 %v1427_v61  ;;  %v1407_v12 = vor.u32 %v1628_v7, %v1404_v8  ;;  %v1629_v14 = vld [vmem:[#allocation5 + $0xac] sm:$0xf]  ;;  %v1411_v16 = vor.u32 %v1631_v13, %v1410_v9  ;;  %v1905_v39 = vmov 2   ;;  %v1618_v53 = vld [vmem:[#allocation5 + $0x4c] sm:$0xf0] }
  0xb0   :  { %v222_v34 = vadd.s32 %v221_v28, %v211_v27  ;;  %684 = vmatpush.bf16.msra.mxu3 %v1431_v2  ;;  %646 = vmatpush.bf16.msra.mxu0 %v1403_v6  ;;  %v1415_v19 = vor.u32 %v1629_v14, %v1412_v17  ;;  %v1388_v27 = vld [vmem:[#allocation5 + $0x90] sm:$0xf0]  ;;  %v1394_v28 = vld [vmem:[#allocation5 + $0x88] sm:$0xf]  ;;  %v1371_v43 = vor.u32 %v1622_v38, %v1370_v37  ;;  %v1619_v60 = vld [vmem:[#allocation5 + $0x54] sm:$0xf0]  ;;  %vm274_vm6 = vweird.f32 %v2004_v11 }
  0xb1   :  { %v200_v32 = vadd.s32 %v199_v25, %v189_v24  ;;  %659 = vmatpush.bf16.msra.mxu1 %v1407_v12  ;;  %v1626_v24 = vld [vmem:[#allocation5 + $0x8c] sm:$0xf0]  ;;  %v1391_v30 = vor.u32 %v1624_v26, %v1388_v27  ;;  %1710 = vset.pattern.permute.xlu1 %v1905_v39  ;;  %v1355_v56 = vor.u32 %v1618_v53, %v1354_v52  ;;  %v1356_v57 = vld [vmem:[#allocation5 + $0x50] sm:$0xf0]  ;;  %v1362_v58 = vld [vmem:[#allocation5 + $0x48] sm:$0xf] }
  0xb2   :  { %v223_v41 = vadd.s32 %v222_v34, %v213_v33  ;;  %v1387_v25 = vor.u32 %v1626_v24, %v1386_v21  ;;  %v1396_v33 = vld [vmem:[#allocation5 + $0x98] sm:$0xf0]  ;;  %1030 = vperm.xlu1 %1710, %v1994_v1   ;;  %v1617_v61 = vld [vmem:[#allocation5 + $0x4c] sm:$0xf]  ;;  %v1363_v63 = vor.u32 %v1619_v60, %v1362_v58  ;;  %v1614_v44 = vld [vmem:[#allocation5 + $0x2c] sm:$0xf0] }
  0xb3   :  { %v2056_v35 = vadd.s32 %v200_v32, %v191_v31  ;;  %672 = vmatpush.bf16.msra.mxu2 %v1411_v16  ;;  %v1627_v31 = vld [vmem:[#allocation5 + $0x94] sm:$0xf0]  ;;  %v1625_v32 = vld [vmem:[#allocation5 + $0x8c] sm:$0xf]  ;;  %v1364_v62 = vld [vmem:[#allocation5 + $0x58] sm:$0xf0] }
  0xb4   :  { %v227_v49 = vadd.s32 1, %v223_v41  ;;  %685 = vmatpush.bf16.msra.mxu3 %v1415_v19  ;;  %647 = vmatpush.bf16.msra.mxu0 %v1387_v25  ;;  %v1395_v34 = vor.u32 %v1627_v31, %v1394_v28  ;;  %v1399_v20 = vor.u32 %v1625_v32, %v1396_v33  ;;  %v1367_v2 = vor.u32 %v1617_v61, %v1364_v62  ;;  %v1612_v7 = vld [vmem:[#allocation5 + $0x24] sm:$0xf]  ;;  %v1340_v8 = vld [vmem:[#allocation5 + $0x30] sm:$0xf0]  ;;  %v1645_v61 = vld [vmem:[#allocation7 + $0x28] sm:$0xff] }
  0xb5   :  { %vm226_vm10 = vc.u32 %v2056_v35, %v2058_v36  ;;  %660 = vmatpush.bf16.msra.mxu1 %v1391_v30  ;;  %v225_v9 = vadd.s32 %v2058_v36, %v2056_v35  ;;  %v1343_v14 = vor.u32 %v1612_v7, %v1340_v8  ;;  %v1346_v16 = vld [vmem:[#allocation5 + $0x28] sm:$0xf]  ;;  %v1615_v17 = vld [vmem:[#allocation5 + $0x34] sm:$0xf0]  ;;  %v1613_v21 = vld [vmem:[#allocation5 + $0x2c] sm:$0xf] }
  0xb6   :  { %v228_v54 = vsel %vm226_vm10, %v227_v49, %v223_v41  ;;  %v1620_v41 = vld [vmem:[#allocation5 + $0x64] sm:$0xf]  ;;  %v1621_v49 = vld [vmem:[#allocation5 + $0x6c] sm:$0xf]  ;;  %v1347_v19 = vor.u32 %v1615_v17, %v1346_v16  ;;  %v1348_v24 = vld [vmem:[#allocation5 + $0x38] sm:$0xf0] }
  0xb7   :  { %v229_v59 = vadd.s32 %v228_v54, %v224_v51  ;;  %673 = vmatpush.bf16.msra.mxu2 %v1395_v34  ;;  %v1375_v47 = vor.u32 %v1620_v41, %v1372_v45  ;;  %v1379_v51 = vor.u32 %v1623_v48, %v1378_v40  ;;  %v1383_v22 = vor.u32 %v1621_v49, %v1380_v50  ;;  %v1616_v54 = vld [vmem:[#allocation5 + $0x44] sm:$0xf]  ;;  %v1322_v25 = vld [vmem:[#allocation5] sm:$0xf]  ;;  %v1610_v36 = vld [vmem:[#allocation5 + $0xc] sm:$0xf0] }
  0xb8   :  { %686 = vmatpush.bf16.msra.mxu3 %v1399_v20  ;;  %648 = vmatpush.bf16.msra.mxu0 %v1371_v43  ;;  %v1351_v30 = vor.u32 %v1613_v21, %v1348_v24  ;;  %v1907_v35 = vmov 3   ;;  %v1608_v31 = vld [vmem:[#allocation5 + $0x4] sm:$0xf]  ;;  %v1323_v32 = vor.u32 %v1610_v36, %v1322_v25  ;;  %v1324_v33 = vld [vmem:[#allocation5 + $0x10] sm:$0xf0]  ;;  %v1908_v48 = vmov 8  }
  0xb9   :  { %v230_v4 = vadd.s32 536870912, %v229_v59  ;;  %661 = vmatpush.bf16.msra.mxu1 %v1375_v47  ;;  %v1330_v34 = vld [vmem:[#allocation5 + $0x8] sm:$0xf]  ;;  %v1611_v20 = vld [vmem:[#allocation5 + $0x14] sm:$0xf0]  ;;  %v1909_v49 = vmov 4  }
  0xba   :  { %1711 = vset.pattern.permute.xlu1 %v1907_v35  ;;  %v1609_v38 = vld [vmem:[#allocation5 + $0xc] sm:$0xf]  ;;  %v1332_v41 = vld [vmem:[#allocation5 + $0x18] sm:$0xf0]  ;;  %1712 = vset.pattern.permute.xlu2 %v1909_v49  ;;  %v1646_v52 = vld [vmem:[#allocation7 + $0x30] sm:$0xff] }
  0xbb   :  { %v2065_v10 = vshrl.u32 %v230_v4, 30  ;;  %674 = vmatpush.bf16.msra.mxu2 %v1379_v51  ;;  %v1338_v4 = vld [vmem:[#allocation5 + $0x20] sm:$0xf]  ;;  %1038 = vperm.xlu1 %1711, %v1994_v1   ;;  %v1335_v39 = vor.u32 %v1609_v38, %v1332_v41  ;;  %v1655_v50 = vld [vmem:[#allocation7 + $0x78] sm:$0xff]  ;;  %v1910_v51 = vmov 6   ;;  %v1641_v38 = vld [vmem:[#allocation7 + $0x8] sm:$0xff] }
  0xbc   :  { %687 = vmatpush.bf16.msra.mxu3 %v1383_v22  ;;  %649 = vmatpush.bf16.msra.mxu0 %v1355_v56  ;;  %v1339_v6 = vor.u32 %v1614_v44, %v1338_v4  ;;  %v1652_v41 = vld [vmem:[#allocation7 + $0x60] sm:$0xff]  ;;  %v1677_v53 = vld [vmem:[#allocation10 + $0x28] sm:$0xff] }
  0xbd   :  { %v232_v18 = vshll.u32 %v2065_v10, 30  ;;  %1046 = vperm.xlu2 %1712, %v1994_v1   ;;  %v1678_v49 = vld [vmem:[#allocation10 + $0x30] sm:$0xff] }
  0xbf   :  { %v2068_v29 = vsub.s32 %v229_v59, %v232_v18  ;;  %v1359_v59 = vor.u32 %v1616_v54, %v1356_v57  ;;  %v1906_v18 = vmov 1   ;;  %675 = vmatpush.bf16.msra.mxu2 %v1363_v63  ;;  %v1911_v63 = vmov 9  }
  0xc0   :  { %1709 = vset.pattern.permute.xlu0 %v1906_v18  ;;  %688 = vmatpush.bf16.msra.mxu3 %v1367_v2  ;;  %v1912_v2 = vmov 5   ;;  %v1913_v18 = vmov 7  }
  0xc1   :  { %vm234_vm11 = vcmp.lt.s32.totalorder %v2068_v29, 0  ;;  %v235_v23 = vsub.s32 0, %v2068_v29  ;;  %662 = vmatpush.bf16.msra.mxu1 %v1359_v59  ;;  %1019 = vperm.xlu0 %1709, %v1994_v1  }
  0xc2   :  { %650 = vmatpush.bf16.msra.mxu0 %v1339_v6 }
  0xc3   :  { %v236_v42 = vsel %vm234_vm11, %v235_v23, %v2068_v29  ;;  %676 = vmatpush.bf16.msra.mxu2 %v1347_v19  ;;  %1714 = vset.pattern.permute.xlu1 %v1910_v51  ;;  %v1667_v51 = vld [vmem:[#allocation7 + $0xd8] sm:$0xff] }
  0xc4   :  { %v237_v46 = vclz %v236_v42  ;;  %689 = vmatpush.bf16.msra.mxu3 %v1351_v30  ;;  %v1331_v42 = vor.u32 %v1611_v20, %v1330_v34  ;;  %1062 = vperm.xlu1 %1714, %v1994_v1   ;;  %v1654_v34 = vld [vmem:[#allocation7 + $0x70] sm:$0xff]  ;;  %v1663_v20 = vld [vmem:[#allocation7 + $0xb8] sm:$0xff] }
  0xc5   :  { %663 = vmatpush.bf16.msra.mxu1 %v1343_v14  ;;  %1713 = vset.pattern.permute.xlu2 %v1912_v2 }
  0xc6   :  { %v1315_v55 = vadd.s32 4294967294, %v237_v46  ;;  %651 = vmatpush.bf16.msra.mxu0 %v1323_v32  ;;  %v1647_v46 = vld [vmem:[#allocation7 + $0x38] sm:$0xff]  ;;  %1054 = vperm.xlu2 %1713, %v1994_v1  }
  0xc7   :  { %677 = vmatpush.bf16.msra.mxu2 %v1331_v42  ;;  %v1661_v42 = vld [vmem:[#allocation7 + $0xa8] sm:$0xff] }
  0xc8   :  { %vm1316_vm12 = vcmp.lt.s32.totalorder %v1315_v55, 0  ;;  %690 = vmatpush.bf16.msra.mxu3 %v1335_v39  ;;  %v1669_v39 = vld [vmem:[#allocation7 + $0xe8] sm:$0xff] }
  0xc9   :  { %v240_v5 = vsel %vm1316_vm12, 0, %v1315_v55  ;;  %1716 = vset.pattern.permute.xlu0 %v1908_v48  ;;  %v255_v55 = vsub.s32 4, %v2065_v10  ;;  %v1650_v48 = vld [vmem:[#allocation7 + $0x50] sm:$0xff] }
  0xca   :  { %v241_v12 = vsub.s32 32, %v240_v5  ;;  %v245_v13 = vsub.s32 4294967266, %v240_v5  ;;  %v242_v26 = vshll.u32 %v2068_v29, %v240_v5  ;;  %v1327_v29 = vor.u32 %v1608_v31, %v1324_v33  ;;  %1078 = vperm.xlu0 %1716, %v1994_v1   ;;  %964 = vmatpush.bf16.msrb.mxu0 %v1647_v46  ;;  %v1644_v5 = vld [vmem:[#allocation7 + $0x20] sm:$0xff]  ;;  %v1643_v33 = vld [vmem:[#allocation7 + $0x18] sm:$0xff] }
  0xcb   :  { %v256_v58 = vsel %vm133_vm13, %v255_v55, %v2065_v10  ;;  %990 = vmatpush.bf16.msrb.mxu2 %v1663_v20  ;;  %v1660_v46 = vld [vmem:[#allocation7 + $0xa0] sm:$0xff] }
  0xcc   :  { %v243_v27 = vshrl.u32 %v225_v9, %v241_v12  ;;  %v246_v28 = vadd.s32 127, %v245_v13  ;;  %664 = vmatpush.bf16.msra.mxu1 %v1327_v29  ;;  %1717 = vset.pattern.permute.xlu1 %v1911_v63  ;;  %v258_v4 = vsel %vm2085_vm14, 0, %v256_v58  ;;  %v1670_v29 = vld [vmem:[#allocation7 + $0xf0] sm:$0xff] }
  0xcd   :  { %1086 = vperm.xlu1 %1717, %v1994_v1   ;;  %v275_v7 = vadd.s32 3, %v258_v4  ;;  %v430_v16 = vand.u32 3, %v258_v4  ;;  %v2108_v58 = vld [vmem:[%s2222_s0] sm:$0xff]  ;;  %v1657_v4 = vld [vmem:[#allocation7 + $0x88] sm:$0xff] }
  0xce   :  { %v244_v23 = vor.u32 %v243_v27, %v242_v26  ;;  %v247_v37 = vshll.u32 %v246_v28, 23  ;;  %965 = vmatpush.bf16.msrb.mxu0 %v1646_v52  ;;  %1715 = vset.pattern.permute.xlu2 %v1913_v18  ;;  %v1649_v52 = vld [vmem:[#allocation7 + $0x48] sm:$0xff]  ;;  %vm1234_vm7 = vcmp.eq.s32.totalorder %v2108_v58, 4  ;;  %vm1220_vm8 = vcmp.eq.s32.totalorder %v2108_v58, 3  ;;  %v1722_v18 = vld [vmem:[#allocation8 + $0x3] ss:$0 sm:$0xff] }
  0xcf   :  { %v276_v14 = vand.u32 3, %v275_v7  ;;  %1070 = vperm.xlu2 %1715, %v1994_v1   ;;  %vm431_vm1 = vcmp.lt.s32.totalorder %v430_v16, 2  ;;  %vm432_vm4 = vcmp.eq.s32.totalorder %v430_v16, 0  ;;  %vm435_vm5 = vcmp.eq.s32.totalorder %v430_v16, 2  ;;  %991 = vmatpush.bf16.msrb.mxu2 %v1662_v3 }
  0xd0   :  { %v248_v43 = vor.u32 4788187, %v247_v37  ;;  %v251_v40 = vcvt.s32.f32 %v244_v23  ;;  %977 = vmatpush.bf16.msrb.mxu1 %v1655_v50  ;;  %v1671_v23 = vld [vmem:[#allocation7 + $0xf8] sm:$0xff]  ;;  %v1653_v37 = vld [vmem:[#allocation7 + $0x68] sm:$0xff]  ;;  %vm1178_vm9 = vcmp.eq.s32.totalorder %v2108_v58, 0  ;;  %v1221_v16 = vsel %vm1220_vm8, 1, %v1898_v0 }
  0xd1   :  { %vm277_vm15 = vcmp.lt.s32.totalorder %v276_v14, 2  ;;  %vm278_vm2 = vcmp.eq.s32.totalorder %v276_v14, 0  ;;  %vm281_vm3 = vcmp.eq.s32.totalorder %v276_v14, 2  ;;  %1003 = vmatpush.bf16.msrb.mxu3 %v1671_v23  ;;  %v1659_v50 = vld [vmem:[#allocation7 + $0x98] sm:$0xff]  ;;  %vm1262_vm10 = vcmp.eq.s32.totalorder %v2108_v58, 6 }
  0xd2   :  { %v249_v45 = vand.u32 2147483647, %v248_v43  ;;  %1720 = vset.pattern.permute.xlu0 %v1898_v0  ;;  %966 = vmatpush.bf16.msrb.mxu0 %v1645_v61  ;;  %v1640_v43 = vld [vmem:[#allocation7] sm:$0xff]  ;;  %vm1206_vm11 = vcmp.eq.s32.totalorder %v2108_v58, 2  ;;  %vm1248_vm12 = vcmp.eq.s32.totalorder %v2108_v58, 5 }
  0xd3   :  { %992 = vmatpush.bf16.msrb.mxu2 %v1661_v42  ;;  %1223 = vperm.xlu0 %1720, %v1221_v16   ;;  %v1176_v16 = vld [vmem:[#allocation2 + $0x8] sm:$0xff] }
  0xd4   :  { %v252_v47 = vmul.f32 %v251_v40, %v249_v45  ;;  %978 = vmatpush.bf16.msrb.mxu1 %v1654_v34  ;;  %v1651_v45 = vld [vmem:[#allocation7 + $0x58] sm:$0xff]  ;;  %v1679_v40 = vld [vmem:[#allocation10 + $0x38] sm:$0xff] }
  0xd5   :  { %1719 = vset.pattern.permute.xlu1 %v1898_v0  ;;  %1004 = vmatpush.bf16.msrb.mxu3 %v1670_v29 }
  0xd6   :  { %v253_v22 = vxor.u32 2147483648, %v252_v47  ;;  %967 = vmatpush.bf16.msrb.mxu0 %v1644_v5 }
  0xd7   :  { %1718 = vset.pattern.permute.xlu2 %v1898_v0  ;;  %993 = vmatpush.bf16.msrb.mxu2 %v1660_v46 }
  0xd8   :  { %v254_v54 = vsel %vm133_vm13, %v253_v22, %v252_v47  ;;  %979 = vmatpush.bf16.msrb.mxu1 %v1653_v37  ;;  %v1668_v47 = vld [vmem:[#allocation7 + $0xe0] sm:$0xff]  ;;  %vm1276_vm13 = vcmp.eq.s32.totalorder %v2108_v58, 7 }
  0xd9   :  { %v257_v56 = vsel %vm2085_vm14, %v2004_v11, %v254_v54  ;;  %v1642_v11 = vld [vmem:[#allocation7 + $0x10] sm:$0xff]  ;;  %1005 = vmatpush.bf16.msrb.mxu3 %v1669_v39  ;;  %v1724_v22 = vld [vmem:[#allocation8] ss:$0 sm:$0xff]  ;;  %v1728_v37 = vld [vmem:[#allocation8 + $0x6] ss:$0 sm:$0xff]  ;;  %v1249_v39 = vsel %vm1248_vm12, 1, %v1898_v0 }
  0xda   :  { %v259_v57 = vmul.f32 %v257_v56, %v257_v56  ;;  %968 = vmatpush.bf16.msrb.mxu0 %v1643_v33  ;;  %v474_v33 = vld [vmem:[%s2226_s4] sm:$0xf] }
  0xdb   :  { %994 = vmatpush.bf16.msrb.mxu2 %v1659_v50  ;;  %v476_v20 = vperm.slane %v474_v33, 0  ;;  %v477_v3 = vperm.slane %v474_v33, 1 }
  0xdc   :  { %v267_v59 = vmul.f32 -0.00019511016, %v259_v57  ;;  %v260_v60 = vmul.f32 -0.001358992, %v259_v57  ;;  %980 = vmatpush.bf16.msrb.mxu1 %v1652_v41 }
  0xdd   :  { %1006 = vmatpush.bf16.msrb.mxu3 %v1668_v47 }
  0xde   :  { %v268_v15 = vadd.f32 0.008332121, %v267_v59  ;;  %v261_v62 = vadd.f32 0.041655596, %v260_v60  ;;  %969 = vmatpush.bf16.msrb.mxu0 %v1642_v11  ;;  %v1648_v59 = vld [vmem:[#allocation7 + $0x40] sm:$0xff]  ;;  %v1676_v60 = vld [vmem:[#allocation10 + $0x20] sm:$0xff] }
  0xe0   :  { %v269_v44 = vmul.f32 %v268_v15, %v259_v57  ;;  %v262_v10 = vmul.f32 %v261_v62, %v259_v57  ;;  %981 = vmatpush.bf16.msrb.mxu1 %v1651_v45  ;;  %v1721_v15 = vld [vmem:[#allocation8 + $0x1] ss:$0 sm:$0xff]  ;;  %v1725_v62 = vld [vmem:[%s2230_s8] ss:$0 sm:$0xff] }
  0xe1   :  { %1007 = vmatpush.bf16.msrb.mxu3 %v1667_v51  ;;  %v478_v51 = vperm.slane %v474_v33, 2 }
  0xe2   :  { %v270_v6 = vadd.f32 -0.16666654, %v269_v44  ;;  %v263_v8 = vadd.f32 -0.4999988, %v262_v10  ;;  %970 = vmatpush.bf16.msrb.mxu0 %v1641_v38  ;;  %v1665_v44 = vld [vmem:[#allocation7 + $0xc8] sm:$0xff] }
  0xe3   :  { %v1675_v10 = vld [vmem:[#allocation10 + $0x18] sm:$0xff]  ;;  %v1729_v38 = vld [vmem:[#allocation8 + $0x7] ss:$0 sm:$0xff] }
  0xe4   :  { %v271_v9 = vmul.f32 %v270_v6, %v259_v57  ;;  %v264_v12 = vmul.f32 %v263_v8, %v259_v57  ;;  %982 = vmatpush.bf16.msrb.mxu1 %v1650_v48  ;;  %v1666_v57 = vld [vmem:[#allocation7 + $0xd0] sm:$0xff]  ;;  %v1723_v6 = vld [vmem:[#allocation8 + $0x2] ss:$0 sm:$0xff] }
  0xe5   :  { %1008 = vmatpush.bf16.msrb.mxu3 %v1666_v57  ;;  %v1656_v8 = vld [vmem:[#allocation7 + $0x80] sm:$0xff] }
  0xe6   :  { %v272_v13 = vadd.f32 1.0, %v271_v9  ;;  %v265_v17 = vadd.f32 1.0, %v264_v12  ;;  %971 = vmatpush.bf16.msrb.mxu0 %v1640_v43  ;;  %v1664_v9 = vld [vmem:[#allocation7 + $0xc0] sm:$0xff]  ;;  %v1235_v12 = vsel %vm1234_vm7, 1, %v1898_v0 }
  0xe8   :  { %v273_v19 = vmul.f32 %v272_v13, %v257_v56  ;;  %v282_v21 = vxor.u32 2147483648, %v265_v17  ;;  %v1658_v56 = vld [vmem:[#allocation7 + $0x90] sm:$0xff]  ;;  %983 = vmatpush.bf16.msrb.mxu1 %v1649_v52  ;;  %v1674_v13 = vld [vmem:[#allocation10 + $0x10] sm:$0xff] }
  0xe9   :  { %995 = vmatpush.bf16.msrb.mxu2 %v1658_v56  ;;  %1009 = vmatpush.bf16.msrb.mxu3 %v1665_v44 }
  0xea   :  { %v279_v24 = vxor.u32 2147483648, %v273_v19  ;;  %v283_v26 = vsel %vm281_vm3, %v282_v21, %v273_v19  ;;  %v437_v28 = vsel %vm435_vm5, %v282_v21, %v273_v19 }
  0xec   :  { %v280_v25 = vsel %vm278_vm2, %v265_v17, %v279_v24  ;;  %v434_v27 = vsel %vm432_vm4, %v265_v17, %v279_v24  ;;  %984 = vmatpush.bf16.msrb.mxu1 %v1648_v59  ;;  %v1179_v17 = vsel %vm1178_vm9, 1, %v1898_v0  ;;  %v1673_v24 = vld [vmem:[#allocation10 + $0x8] sm:$0xff] }
  0xed   :  { %v284_v30 = vsel %vm277_vm15, %v280_v25, %v283_v26  ;;  %v438_v35 = vsel %vm431_vm1, %v434_v27, %v437_v28  ;;  %996 = vmatpush.bf16.msrb.mxu2 %v1657_v4  ;;  %1010 = vmatpush.bf16.msrb.mxu3 %v1664_v9  ;;  %v1726_v27 = vld [vmem:[#allocation8 + $0x4] ss:$0 sm:$0xff] }
  0xee   :  { %v285_v36 = vsel %vm274_vm6, nan, %v284_v30  ;;  %v439_v31 = vsel %vm274_vm6, nan, %v438_v35  ;;  %1181 = vperm.xlu2 %1718, %v1179_v17   ;;  %v1263_v30 = vsel %vm1262_vm10, 1, %v1898_v0  ;;  %v1672_v35 = vld [vmem:[#allocation10] sm:$0xff] }
  0xef   :  { %v440_v1 = vsel %vm117_vm0, %v285_v36, %v439_v31  ;;  %vm1192_vm0 = vcmp.eq.s32.totalorder %v2108_v58, 1  ;;  %v1207_v36 = vsel %vm1206_vm11, 1, %v1898_v0 }
  0xf0   :  { %v441_v32 = vpack.c.bf16 %v440_v1, %v440_v1  ;;  %v1193_v61 = vsel %vm1192_vm0, 1, %v1898_v0 }
  0xf1   :  { %1195 = vperm.xlu1 %1719, %v1193_v61   ;;  %997 = vmatpush.bf16.msrb.mxu2 %v1656_v8 }
  0xf2   :  { %652 = vmatmul.bf16.vlgmr.msra.gmra.mxu0 %v441_v32  ;;  %665 = vmatmul.bf16.vlgmr.msra.gmra.mxu1 %v441_v32 }
  0xf3   :  { %678 = vmatmul.bf16.vlgmr.msra.gmra.mxu2 %v441_v32  ;;  %691 = vmatmul.bf16.vlgmr.msra.gmra.mxu3 %v441_v32  ;;  %v1727_v32 = vld [vmem:[#allocation8 + $0x5] ss:$0 sm:$0xff] }
  0xf4   :  { %1162 = vmatpush.bf16.msra.mxu0 %v1679_v40 }
  0xf6   :  { %1209 = vperm.xlu2 %1718, %v1207_v36  }
  0xf8   :  { %1163 = vmatpush.bf16.msra.mxu0 %v1678_v49 }
  0xf9   :  { %1237 = vperm.xlu1 %1719, %v1235_v12  }
  0xfc   :  { %1164 = vmatpush.bf16.msra.mxu0 %v1677_v53 }
  0xfe   :  { %1251 = vperm.xlu2 %1718, %v1249_v39  }
 0x100   :  { %1165 = vmatpush.bf16.msra.mxu0 %v1676_v60 }
 0x101   :  { %1265 = vperm.xlu1 %1719, %v1263_v30  }
 0x104   :  { %1166 = vmatpush.bf16.msra.mxu0 %v1675_v10 }
 0x108   :  { %1167 = vmatpush.bf16.msra.mxu0 %v1674_v13 }
 0x10c   :  { %1168 = vmatpush.bf16.msra.mxu0 %v1673_v24 }
 0x110   :  { %1169 = vmatpush.bf16.msra.mxu0 %v1672_v35 }
 0x117   :  { %v1047_v2 = vpop.permute.xlu2 %1046 }
 0x118   :  { %v1050_v26 = vmul.f32 %v1722_v18, %v1047_v2  ;;  %v1185_v18 = vperm.slane %v1176_v16, 0 }
 0x120   :  { %v1055_v25 = vpop.permute.xlu2 %1054 }
 0x121   :  { %v1058_v1 = vmul.f32 %v1726_v27, %v1055_v25 }
 0x124   :  { %v1031_v54 = vpop.permute.xlu1 %1030 }
 0x125   :  { %v1034_v5 = vmul.f32 %v1721_v15, %v1031_v54 }
 0x129   :  { %v1071_v29 = vpop.permute.xlu2 %1070 }
 0x12a   :  { %v1074_v45 = vmul.f32 %v1728_v37, %v1071_v29 }
 0x12d   :  { %v1039_v14 = vpop.permute.xlu1 %1038 }
 0x12e   :  { %v1042_v19 = vmul.f32 %v1723_v6, %v1039_v14  ;;  %v1175_v14 = vld [vmem:[#allocation2] sm:$0xff] }
 0x12f   :  { %v1184_v17 = vperm.slane %v1175_v14, 0  ;;  %v1212_v27 = vperm.slane %v1175_v14, 2 }
 0x133   :  { %v1020_v55 = vpop.permute.xlu0 %1019 }
 0x134   :  { %v1023_v63 = vmul.f32 %v1724_v22, %v1020_v55  ;;  %v479_v22 = vperm.slane %v474_v33, 3  ;;  %v1730_v55 = vld [vmem:[#allocation8 + $0x8] ss:$0 sm:$0xff] }
 0x136   :  { %v1027_v7 = vadd.f32 %v1725_v62, %v1023_v63  ;;  %v1063_v34 = vpop.permute.xlu1 %1062  ;;  %v1277_v63 = vsel %vm1276_vm13, 1, %v1898_v0 }
 0x137   :  { %v1066_v11 = vmul.f32 %v1727_v32, %v1063_v34  ;;  %1279 = vperm.xlu2 %1718, %v1277_v63  }
 0x138   :  { %v1035_v21 = vadd.f32 %v1034_v5, %v1027_v7 }
 0x13a   :  { %v1043_v28 = vadd.f32 %v1042_v19, %v1035_v21  ;;  %v1198_v19 = vperm.slane %v1175_v14, 1  ;;  %v1199_v21 = vperm.slane %v1176_v16, 1 }
 0x13c   :  { %v1051_v31 = vadd.f32 %v1050_v26, %v1043_v28  ;;  %v1079_v40 = vpop.permute.xlu0 %1078  ;;  %v1213_v28 = vperm.slane %v1176_v16, 2 }
 0x13d   :  { %v1082_v50 = vmul.f32 %v1729_v38, %v1079_v40 }
 0x13e   :  { %v1059_v23 = vadd.f32 %v1058_v1, %v1051_v31  ;;  %v1226_v31 = vperm.slane %v1175_v14, 3  ;;  %v1227_v1 = vperm.slane %v1176_v16, 3 }
 0x13f   :  { %v1087_v56 = vpop.permute.xlu1 %1086 }
 0x140   :  { %v1067_v43 = vadd.f32 %v1066_v11, %v1059_v23  ;;  %v1090_v4 = vmul.f32 %v1730_v55, %v1087_v56  ;;  %v1241_v23 = vperm.slane %v1176_v16, 4  ;;  %v1731_v55 = vld [vmem:[%s2228_s6] ss:$0 sm:$0xff]  ;;  %s1914_s6 = smov [#allocation11]  }
 0x142   :  { %v1075_v52 = vadd.f32 %v1074_v45, %v1067_v43  ;;  %v1268_v43 = vperm.slane %v1175_v14, 6  ;;  %v1269_v45 = vperm.slane %v1176_v16, 6 }
 0x144   :  { %v1083_v2 = vadd.f32 %v1082_v50, %v1075_v52 }
 0x145   :  { %v2157_v11 = vpop.permute.xlu0 %1223 }
 0x146   :  { %v1091_v7 = vadd.f32 %v1090_v4, %v1083_v2  ;;  %vm1225_vm3 = vcmp.eq.s32.totalorder %v2157_v11, 1 }
 0x148   :  { %v1092_v9 = vmax.f32 %v1091_v7, 0.0  ;;  %v2132_v13 = vpop.permute.xlu2 %1181 }
 0x149   :  { %vm1183_vm14 = vcmp.eq.s32.totalorder %v2132_v13, 1 }
 0x14a   :  { %v1093_v12 = vpack.c.bf16 %v1092_v9, %v1092_v9  ;;  %v1188_v25 = vsel %vm1183_vm14, %v1184_v17, 0.0  ;;  %v1189_v26 = vsel %vm1183_vm14, %v1185_v18, 0.0 }
 0x150   :  { %v2134_v0 = vpop.permute.xlu2 %1209 }
 0x151   :  { %vm1211_vm1 = vcmp.eq.s32.totalorder %v2134_v0, 1 }
 0x158   :  { %v2144_v30 = vpop.permute.xlu2 %1251 }
 0x159   :  { %vm1253_vm4 = vcmp.eq.s32.totalorder %v2144_v30, 1 }
 0x163   :  { %v2137_v24 = vpop.permute.xlu1 %1195 }
 0x164   :  { %vm1197_vm15 = vcmp.eq.s32.totalorder %v2137_v24, 1 }
 0x165   :  { %v1202_v35 = vsel %vm1197_vm15, %v1198_v19, %v1188_v25  ;;  %v1203_v36 = vsel %vm1197_vm15, %v1199_v21, %v1189_v26 }
 0x166   :  { %v1216_v32 = vsel %vm1211_vm1, %v1212_v27, %v1202_v35  ;;  %v1217_v33 = vsel %vm1211_vm1, %v1213_v28, %v1203_v36 }
 0x167   :  { %v1230_v37 = vsel %vm1225_vm3, %v1226_v31, %v1216_v32 }
 0x16b   :  { %v2155_v34 = vpop.permute.xlu1 %1237 }
 0x16c   :  { %vm1239_vm2 = vcmp.eq.s32.totalorder %v2155_v34, 1 }
 0x16f   :  { %v653_v41 = vpop.f32.mrf.mxu0  ;;  %v666_v42 = vpop.f32.mrf.mxu1 }
 0x170   :  { %v654_v46 = vadd.f32 %v653_v41, %v476_v20  ;;  %v667_v47 = vadd.f32 %v666_v42, %v477_v3  ;;  %v1240_v20 = vperm.slane %v1175_v14, 4  ;;  %v1231_v3 = vsel %vm1225_vm3, %v1227_v1, %v1217_v33 }
 0x171   :  { %v1245_v38 = vsel %vm1239_vm2, %v1241_v23, %v1231_v3  ;;  %v1254_v41 = vperm.slane %v1175_v14, 5  ;;  %v1255_v42 = vperm.slane %v1176_v16, 5 }
 0x172   :  { %v696_v48 = vmax.f32 %v654_v46, 0.0  ;;  %v697_v49 = vmax.f32 %v667_v47, 0.0  ;;  %v1244_v29 = vsel %vm1239_vm2, %v1240_v20, %v1230_v37  ;;  %v1282_v47 = vperm.slane %v1175_v14, 7 }
 0x173   :  { %v1258_v40 = vsel %vm1253_vm4, %v1254_v41, %v1244_v29  ;;  %v1259_v46 = vsel %vm1253_vm4, %v1255_v42, %v1245_v38 }
 0x174   :  { %v700_v53 = vpack.c.bf16 %v696_v48, %v696_v48  ;;  %v701_v54 = vpack.c.bf16 %v697_v49, %v697_v49  ;;  %v1283_v48 = vperm.slane %v1176_v16, 7  ;;  %v1266_v49 = vpop.permute.xlu1 %1265 }
 0x175   :  { %vm1267_vm6 = vcmp.eq.s32.totalorder %v1266_v49, 1 }
 0x176   :  { %v679_v57 = vpop.f32.mrf.mxu2  ;;  %v692_v59 = vpop.f32.mrf.mxu3  ;;  %972 = vmatmul.bf16.vlgmr.msrb.gmra.mxu0 %v700_v53  ;;  %985 = vmatmul.bf16.vlgmr.msrb.gmra.mxu1 %v701_v54  ;;  %v1272_v50 = vsel %vm1267_vm6, %v1268_v43, %v1258_v40 }
 0x177   :  { %v680_v60 = vadd.f32 %v679_v57, %v478_v51  ;;  %v693_v61 = vadd.f32 %v692_v59, %v479_v22  ;;  %v655_v15 = vpop.f32.mrf.mxu0  ;;  %v668_v62 = vpop.f32.mrf.mxu1  ;;  %v1273_v51 = vsel %vm1267_vm6, %v1269_v45, %v1259_v46 }
 0x178   :  { %v1732_v62 = vld [vmem:[%s2232_s10] ss:$0 sm:$0xff]  ;;  %s1299_s10 = sshll.u32 %s1914_s6, 4  ;;  %s1300_s10 = int_to_ptr.vmem [resolvable:$true] %s1299_s10 }
 0x179   :  { %v698_v44 = vmax.f32 %v680_v60, 0.0  ;;  %v699_v10 = vmax.f32 %v693_v61, 0.0 }
 0x17b   :  { %v702_v5 = vpack.c.bf16 %v698_v44, %v698_v44  ;;  %v703_v6 = vpack.c.bf16 %v699_v10, %v699_v10 }
 0x17d   :  { %998 = vmatmul.bf16.vlgmr.msrb.gmra.mxu2 %v702_v5  ;;  %1011 = vmatmul.bf16.vlgmr.msrb.gmra.mxu3 %v703_v6 }
 0x17e   :  { %v681_v58 = vpop.f32.mrf.mxu2  ;;  %v694_v8 = vpop.f32.mrf.mxu3 }
 0x186   :  { %1170 = vmatmul.bf16.vlgmr.msra.gmra.mxu0 %v1093_v12 }
 0x191   :  { %v2170_v39 = vpop.permute.xlu2 %1279 }
 0x192   :  { %vm1281_vm5 = vcmp.eq.s32.totalorder %v2170_v39, 1 }
 0x193   :  { %v1286_v22 = vsel %vm1281_vm5, %v1282_v47, %v1272_v50  ;;  %v1287_v52 = vsel %vm1281_vm5, %v1283_v48, %v1273_v51 }
 0x194   :  { %1290 = vst [vmem:[#allocation11] sm:$0xff] %v1286_v22 }
 0x195   :  { %1291 = vst [vmem:[#allocation11 + $0x8] sm:$0xff] %v1287_v52 }
 0x1f3   :  { %v973_v53 = vpop.f32.mrf.mxu0  ;;  %v986_v54 = vpop.f32.mrf.mxu1 }
 0x1f4   :  { %v974_v56 = vadd.f32 %v1731_v55, %v973_v53 }
 0x1f6   :  { %v987_v60 = vadd.f32 %v986_v54, %v974_v56 }
 0x1fb   :  { %v975_v57 = vpop.f32.mrf.mxu0  ;;  %v988_v59 = vpop.f32.mrf.mxu1 }
 0x200   :  { %v999_v61 = vpop.f32.mrf.mxu2  ;;  %v1012_v15 = vpop.f32.mrf.mxu3 }
 0x201   :  { %v1000_v63 = vadd.f32 %v999_v61, %v987_v60 }
 0x203   :  { %v1013_v2 = vadd.f32 %v1012_v15, %v1000_v63  ;;  %v1171_v4 = vpop.f32.mrf.mxu0 }
 0x204   :  { %v1172_v44 = vadd.f32 %v1732_v62, %v1171_v4 }
 0x205   :  { %v1186_v10 = vperm.slane %v1013_v2, 0  ;;  %v1200_v5 = vperm.slane %v1013_v2, 1  ;;  %v1214_v8 = vperm.slane %v1013_v2, 2  ;;  %v1228_v18 = vperm.slane %v1013_v2, 3 }
 0x206   :  { %v1187_v6 = vperm.slane %v1172_v44, 0  ;;  %v1201_v7 = vperm.slane %v1172_v44, 1  ;;  %v1215_v17 = vperm.slane %v1172_v44, 2  ;;  %v1229_v25 = vperm.slane %v1172_v44, 3 }
 0x207   :  { %v1190_v58 = vsel %vm1183_vm14, %v1186_v10, 0.0  ;;  %v1242_v26 = vperm.slane %v1013_v2, 4  ;;  %v1243_v28 = vperm.slane %v1172_v44, 4  ;;  %v1256_v35 = vperm.slane %v1013_v2, 5 }
 0x208   :  { %v1001_v9 = vpop.f32.mrf.mxu2  ;;  %v1014_v12 = vpop.f32.mrf.mxu3  ;;  %v1191_v14 = vsel %vm1183_vm14, %v1187_v6, 0.0  ;;  %v1204_v16 = vsel %vm1197_vm15, %v1200_v5, %v1190_v58  ;;  %v1257_v1 = vperm.slane %v1172_v44, 5  ;;  %v1270_v32 = vperm.slane %v1013_v2, 6 }
 0x209   :  { %v1205_v19 = vsel %vm1197_vm15, %v1201_v7, %v1191_v14  ;;  %v1218_v21 = vsel %vm1211_vm1, %v1214_v8, %v1204_v16  ;;  %v1271_v20 = vperm.slane %v1172_v44, 6  ;;  %v1284_v23 = vperm.slane %v1013_v2, 7 }
 0x20a   :  { %v1219_v27 = vsel %vm1211_vm1, %v1215_v17, %v1205_v19  ;;  %v1232_v13 = vsel %vm1225_vm3, %v1228_v18, %v1218_v21  ;;  %v1285_v3 = vperm.slane %v1172_v44, 7 }
 0x20b   :  { %v1173_v36 = vpop.f32.mrf.mxu0  ;;  %v1233_v31 = vsel %vm1225_vm3, %v1229_v25, %v1219_v27  ;;  %v1246_v24 = vsel %vm1239_vm2, %v1242_v26, %v1232_v13 }
 0x20c   :  { %v1247_v0 = vsel %vm1239_vm2, %v1243_v28, %v1233_v31  ;;  %v1260_v33 = vsel %vm1253_vm4, %v1256_v35, %v1246_v24 }
 0x20d   :  { %v1261_v11 = vsel %vm1253_vm4, %v1257_v1, %v1247_v0  ;;  %v1274_v37 = vsel %vm1267_vm6, %v1270_v32, %v1260_v33 }
 0x20e   :  { %v1275_v29 = vsel %vm1267_vm6, %v1271_v20, %v1261_v11  ;;  %v1288_v38 = vsel %vm1281_vm5, %v1284_v23, %v1274_v37 }
 0x20f   :  { %v1289_v34 = vsel %vm1281_vm5, %v1285_v3, %v1275_v29  ;;  %1292 = vst [vmem:[#allocation11 + $0x10] sm:$0xff] %v1288_v38 }
 0x210   :  { %1293 = vst [vmem:[#allocation11 + $0x18] sm:$0xff] %v1289_v34 }
 0x211   :  { %1304 = dma.vmem_to_hbm [thread:$0]  %s1300_s10, 512, %s1302_s14, [#allocation4]  }
 0x212   :  { %1885 = dma.done.wait [#allocation4], 512  }
 0x213   :  { %1886 = vsyncadd [#allocation4], 4294966784 }
 0x214   :  { %1309 = vsyncpa [#allocation3], 1 }
 0x215   :  { %1310 = vsyncpa [#allocation6], 1 }
 0x216   :  { %1311 = vsyncpa [#allocation9], 1 }
 0x217   :  { %1312 = vsyncpa [#allocation4], 1 }

</bundles_post_ra>
